<compile_context>
chip_gen: v5e
topology: v5e:2x2
jax: 0.10.0
libtpu: 0.0.40
codegen_flags: <defaults>
</compile_context>

<pallas_src>
import functools
import math

import jax
import jax.numpy as jnp
from jax.experimental import pallas as pl
from jax.experimental.pallas import tpu as pltpu


_TARGET_BLOCK_BYTES = 2 * 1024 * 1024   # ~2 MiB of x per grid step
_MIN_BLOCK_BYTES = 32 * 1024            # never shrink blocks below this
_MIN_GRID_BLOCKS = 8                    # aim for >= this many grid steps
_VMEM_LIMIT_BYTES = 32 * 1024 * 1024    # safe on v5e/v6e (128 MiB) and v7x (64 MiB)
_CF_TARGET_ROWS = 32                    # row-block target, packed channels_first


def _round_up(x, m):
    return ((x + m - 1) // m) * m


def _sublane_align(dtype):
    # 32-bit dtypes tile sublanes in 8s; sub-32-bit dtypes pack 2x/4x per sublane.
    return max(8, 32 // jnp.dtype(dtype).itemsize)


def _lcm(a, b):
    return a * b // math.gcd(a, b)


_PREFER_BF16_SPLIT = None


def _prefers_bf16_split():
    """True on TPU v2-v5: f32 'HIGHEST' MXU emulation (6 bf16 passes per dot)
    would push the packed small-C path past the HBM roofline there."""
    global _PREFER_BF16_SPLIT
    if _PREFER_BF16_SPLIT is None:
        try:
            kind = jax.devices()[0].device_kind.lower()
            _PREFER_BF16_SPLIT = any(t in kind for t in ("v2", "v3", "v4", "v5"))
        except Exception:
            _PREFER_BF16_SPLIT = False
    return _PREFER_BF16_SPLIT


def _pick_tile(n, unit_bytes, align, min_blocks=_MIN_GRID_BLOCKS):
    """Pick a tile size along an axis of extent `n`.

    - stays within the ~_TARGET_BLOCK_BYTES budget (unit_bytes per unit of n),
    - aims for at least `min_blocks` grid steps (pipeline overlap + both v7x
      TensorCores), but never shrinks a block below _MIN_BLOCK_BYTES,
    - is a multiple of `align` (lane/sublane density),
    - prefers an exact divisor of n; otherwise the pl.cdiv grid gets a
      Pallas-masked partial tail block (reduction axis is never tiled).
    """
    if n <= align:
        return n
    unit_bytes = max(1, unit_bytes)
    cap_budget = max(align, _TARGET_BLOCK_BYTES // unit_bytes // align * align)
    want = _round_up(max(1, -(-n // max(1, min_blocks))), align)
    floor = _round_up(max(align, _MIN_BLOCK_BYTES // unit_bytes), align)
    cap = min(cap_budget, max(want, floor))
    cap = max(align, min(cap, n) // align * align)
    t = cap
    while t >= align:
        if n % t == 0:
            return t
        t -= align
    return cap


# ------------------------------ MXU helpers ----------------------------------
def _split3_bf16(a):
    # Exact 3-way bf16 decomposition of an f32 array: a == hi + mid + lo.
    hi = a.astype(jnp.bfloat16)
    r1 = a - hi.astype(jnp.float32)
    mid = r1.astype(jnp.bfloat16)
    lo = (r1 - mid.astype(jnp.float32)).astype(jnp.bfloat16)
    return hi, mid, lo


def _seg_dot(a, seg, exact_splits):
    # a (TN, 128) f32 @ seg (128, 128) block-diagonal (entries 1/C).
    # Exact in f32 either via the MXU fp32 path (HIGHEST) or via an explicit
    # 3-way bf16 split of `a` against a bf16 seg (half the MXU passes).  The
    # per-operand precision tuple (HIGHEST, DEFAULT) is not supported by the
    # Mosaic lowering, hence the manual split on pre-v6 chips.
    if exact_splits:
        hi, mid, lo = _split3_bf16(a)
        out = jax.lax.dot(hi, seg, preferred_element_type=jnp.float32)
        out = out + jax.lax.dot(mid, seg, preferred_element_type=jnp.float32)
        out = out + jax.lax.dot(lo, seg, preferred_element_type=jnp.float32)
        return out
    return jax.lax.dot(a, seg, precision=jax.lax.Precision.HIGHEST,
                       preferred_element_type=jnp.float32)


# ----------------------------- channels_last ---------------------------------
def _ln_last_kernel(x_ref, w_ref, b_ref, o_ref, *, eps):
    # Generic path: x_ref (TN, C), reduce over lanes.  w/b: (1, C) f32.
    x = x_ref[...].astype(jnp.float32)
    u = jnp.mean(x, axis=-1, keepdims=True)
    xc = x - u
    s = jnp.mean(xc * xc, axis=-1, keepdims=True)          # biased variance
    y = xc * jax.lax.rsqrt(s + eps)
    o_ref[...] = (y * w_ref[...] + b_ref[...]).astype(o_ref.dtype)


def _ln_last_packed_kernel(x_ref, w_ref, b_ref, seg_ref, o_ref, *, eps,
                           exact_splits):
    # Lane-dense small-C path: each 128-lane row packs (128 // C) original
    # rows; seg broadcasts each C-lane segment's mean back onto its own lanes
    # (MXU), so loads/stores are full-width vst (no masked partial stores).
    x = x_ref[...].astype(jnp.float32)
    seg = seg_ref[...]
    u = _seg_dot(x, seg, exact_splits)
    xc = x - u
    s = _seg_dot(xc * xc, seg, exact_splits)
    y = xc * jax.lax.rsqrt(s + eps)
    o_ref[...] = (y * w_ref[...] + b_ref[...]).astype(o_ref.dtype)


def layer_norm_channels_last(x, weight, bias, eps=1e-6):
    orig_shape = x.shape
    C = orig_shape[-1]
    n_rows = 1
    for d in orig_shape[:-1]:
        n_rows *= d
    itemsize = jnp.dtype(x.dtype).itemsize
    align = _sublane_align(x.dtype)
    w = weight.reshape(-1).astype(jnp.float32)
    b = bias.reshape(-1).astype(jnp.float32)

    # ---- lane-dense packed path for small C ---------------------------------
    packable = (0 < C < 128) and (128 % C == 0) and n_rows > 0 \
        and (n_rows % (128 // C) == 0)
    if packable:
        k = 128 // C
        n_packed = n_rows // k
        xf = x.reshape(n_packed, 128)                   # free, contiguous reshape
        w2 = jnp.tile(w, k).reshape(1, 128)
        b2 = jnp.tile(b, k).reshape(1, 128)
        lane = jnp.arange(128, dtype=jnp.int32) // C
        # 1/C folded into the segment matrix (exact: C is a power of two here).
        seg = (lane[:, None] == lane[None, :]).astype(jnp.float32) * (1.0 / C)
        exact_splits = _prefers_bf16_split()
        if exact_splits:
            seg = seg.astype(jnp.bfloat16)              # 1/C exact in bf16

        tile_n = _pick_tile(n_packed, 128 * itemsize, align)
        grid = (pl.cdiv(n_packed, tile_n),)

        out = pl.pallas_call(
            functools.partial(_ln_last_packed_kernel, eps=eps,
                              exact_splits=exact_splits),
            out_shape=jax.ShapeDtypeStruct((n_packed, 128), x.dtype),
            grid_spec=pltpu.PrefetchScalarGridSpec(
                num_scalar_prefetch=0,
                grid=grid,
                in_specs=[
                    pl.BlockSpec((tile_n, 128), lambda i: (i, 0)),
                    pl.BlockSpec((1, 128), lambda i: (0, 0)),
                    pl.BlockSpec((1, 128), lambda i: (0, 0)),
                    pl.BlockSpec((128, 128), lambda i: (0, 0)),
                ],
                out_specs=pl.BlockSpec((tile_n, 128), lambda i: (i, 0)),
            ),
            compiler_params=pltpu.CompilerParams(
                dimension_semantics=("parallel",),
                vmem_limit_bytes=_VMEM_LIMIT_BYTES),
        )(xf, w2, b2, seg)
        return out.reshape(orig_shape)

    # ---- generic path (C >= 128 or not packable) ----------------------------
    xf = x.reshape(n_rows, C)
    w2 = w.reshape(1, C)
    b2 = b.reshape(1, C)
    tile_n = _pick_tile(n_rows, _round_up(C, 128) * itemsize, align)
    grid = (pl.cdiv(n_rows, tile_n),)

    out = pl.pallas_call(
        functools.partial(_ln_last_kernel, eps=eps),
        out_shape=jax.ShapeDtypeStruct((n_rows, C), x.dtype),
        grid_spec=pltpu.PrefetchScalarGridSpec(
            num_scalar_prefetch=0,
            grid=grid,
            in_specs=[
                pl.BlockSpec((tile_n, C), lambda i: (i, 0)),
                pl.BlockSpec((1, C), lambda i: (0, 0)),
                pl.BlockSpec((1, C), lambda i: (0, 0)),
            ],
            out_specs=pl.BlockSpec((tile_n, C), lambda i: (i, 0)),
        ),
        compiler_params=pltpu.CompilerParams(
            dimension_semantics=("parallel",),
            vmem_limit_bytes=_VMEM_LIMIT_BYTES),
    )(xf, w2, b2)
    return out.reshape(orig_shape)


# ----------------------------- channels_first --------------------------------
def _ln_first_kernel(x_ref, w_ref, b_ref, o_ref, *, eps):
    # Generic path: x_ref (TB, C, TS); C on sublanes, spatial on lanes.
    x = x_ref[...].astype(jnp.float32)
    u = jnp.mean(x, axis=1, keepdims=True)
    xc = x - u
    s = jnp.mean(xc * xc, axis=1, keepdims=True)            # biased variance
    y = xc * jax.lax.rsqrt(s + eps)
    o_ref[...] = (y * w_ref[...] + b_ref[...]).astype(o_ref.dtype)


def _ln_first_packed_kernel(x_ref, w_ref, b_ref, seg_ref, o_ref, *, eps):
    # Sublane-packed small-C path.  x_ref: (TR, TS), rows = flattened
    # (batch, channel) covering whole C-groups.  seg_ref: (TR, TR) block-
    # diagonal with entries 1/C; the tiny MXU dot (contraction dim TR <= ~32)
    # replaces a padded cross-sublane reduce.  w/b: (TR, 1) per-row params.
    x = x_ref[...].astype(jnp.float32)
    seg = seg_ref[...]
    u = jax.lax.dot(seg, x, precision=jax.lax.Precision.HIGHEST,
                    preferred_element_type=jnp.float32)
    xc = x - u
    s = jax.lax.dot(seg, xc * xc, precision=jax.lax.Precision.HIGHEST,
                    preferred_element_type=jnp.float32)
    y = xc * jax.lax.rsqrt(s + eps)
    o_ref[...] = (y * w_ref[...] + b_ref[...]).astype(o_ref.dtype)


def layer_norm_channels_first(x, weight, bias, eps=1e-6):
    B, C, H, W = x.shape
    S = H * W
    itemsize = jnp.dtype(x.dtype).itemsize
    align = _sublane_align(x.dtype)
    w = weight.reshape(-1).astype(jnp.float32)
    b = bias.reshape(-1).astype(jnp.float32)

    R = B * C
    tr_base = _lcm(C, align)

    # ---- sublane-packed path for small C (avoids ~2x sublane padding) -------
    if C < align and R >= tr_base:
        xf = x.reshape(R, S)                                # free reshape
        tr = tr_base * max(1, min(R // tr_base, max(1, _CF_TARGET_ROWS // tr_base)))
        reps = tr // C
        w_rows = jnp.tile(w, reps).reshape(tr, 1)
        b_rows = jnp.tile(b, reps).reshape(tr, 1)
        grp = jnp.arange(tr, dtype=jnp.int32) // C
        seg = (grp[:, None] == grp[None, :]).astype(jnp.float32) * (1.0 / C)

        row_blocks = pl.cdiv(R, tr)
        min_s_blocks = max(1, -(-_MIN_GRID_BLOCKS // row_blocks))
        tile_s = _pick_tile(S, tr * itemsize, 128, min_blocks=min_s_blocks)
        grid = (row_blocks, pl.cdiv(S, tile_s))

        out = pl.pallas_call(
            functools.partial(_ln_first_packed_kernel, eps=eps),
            out_shape=jax.ShapeDtypeStruct((R, S), x.dtype),
            grid_spec=pltpu.PrefetchScalarGridSpec(
                num_scalar_prefetch=0,
                grid=grid,
                in_specs=[
                    pl.BlockSpec((tr, tile_s), lambda i, j: (i, j)),
                    pl.BlockSpec((tr, 1), lambda i, j: (0, 0)),
                    pl.BlockSpec((tr, 1), lambda i, j: (0, 0)),
                    pl.BlockSpec((tr, tr), lambda i, j: (0, 0)),
                ],
                out_specs=pl.BlockSpec((tr, tile_s), lambda i, j: (i, j)),
            ),
            compiler_params=pltpu.CompilerParams(
                dimension_semantics=("parallel", "parallel"),
                vmem_limit_bytes=_VMEM_LIMIT_BYTES),
        )(xf, w_rows, b_rows, seg)
        return out.reshape(B, C, H, W)

    # ---- generic path --------------------------------------------------------
    xf = x.reshape(B, C, S)
    w2 = w.reshape(1, C, 1)
    b2 = b.reshape(1, C, 1)
    c_pad = _round_up(C, align)
    tile_s = _pick_tile(S, c_pad * itemsize, 128)
    s_blocks = pl.cdiv(S, tile_s)
    min_b_blocks = max(1, -(-_MIN_GRID_BLOCKS // s_blocks))
    tile_b = _pick_tile(B, c_pad * _round_up(tile_s, 128) * itemsize, 1,
                        min_blocks=min_b_blocks)
    grid = (pl.cdiv(B, tile_b), s_blocks)

    out = pl.pallas_call(
        functools.partial(_ln_first_kernel, eps=eps),
        out_shape=jax.ShapeDtypeStruct((B, C, S), x.dtype),
        grid_spec=pltpu.PrefetchScalarGridSpec(
            num_scalar_prefetch=0,
            grid=grid,
            in_specs=[
                pl.BlockSpec((tile_b, C, tile_s), lambda i, j: (i, 0, j)),
                pl.BlockSpec((1, C, 1), lambda i, j: (0, 0, 0)),
                pl.BlockSpec((1, C, 1), lambda i, j: (0, 0, 0)),
            ],
            out_specs=pl.BlockSpec((tile_b, C, tile_s), lambda i, j: (i, 0, j)),
        ),
        compiler_params=pltpu.CompilerParams(
            dimension_semantics=("parallel", "parallel"),
            vmem_limit_bytes=_VMEM_LIMIT_BYTES),
    )(xf, w2, b2)
    return out.reshape(B, C, H, W)


def layer_norm(x, weight, bias, eps=1e-6, data_format="channels_last"):
    if data_format == "channels_last":
        return layer_norm_channels_last(x, weight, bias, eps)
    if data_format == "channels_first":
        return layer_norm_channels_first(x, weight, bias, eps)
    raise NotImplementedError(data_format)


# ------------------------------- references ----------------------------------
def _ref_channels_last(x, w, b, eps):
    u = jnp.mean(x, axis=-1, keepdims=True)
    s = jnp.mean((x - u) ** 2, axis=-1, keepdims=True)
    return (x - u) / jnp.sqrt(s + eps) * w + b


def _ref_channels_first(x, w, b, eps):
    u = jnp.mean(x, axis=1, keepdims=True)
    s = jnp.mean((x - u) ** 2, axis=1, keepdims=True)
    xh = (x - u) / jnp.sqrt(s + eps)
    return w[None, :, None, None] * xh + b[None, :, None, None]


if __name__ == "__main__":
    key = jax.random.PRNGKey(0)
    keys = jax.random.split(key, 12)
    eps = 1e-6

    def affine(kw, kb, c):
        w = 1.0 + 0.1 * jax.random.normal(kw, (c,), dtype=jnp.float32)
        b = 0.1 * jax.random.normal(kb, (c,), dtype=jnp.float32)
        return w, b

    # 1) channels_last, C=32 -> lane-packed seg-dot path
    x1 = jax.random.normal(keys[0], (2, 16, 16, 32), dtype=jnp.float32)
    w1, b1 = affine(keys[1], keys[2], 32)
    y1 = jax.block_until_ready(layer_norm(x1, w1, b1, eps, "channels_last"))
    r1 = _ref_channels_last(x1, w1, b1, eps)
    assert y1.shape == x1.shape and y1.dtype == x1.dtype
    assert jnp.allclose(y1, r1, atol=1e-5, rtol=1e-5)

    # 2) channels_last, C=128 -> generic lane-reduction path
    x2 = jax.random.normal(keys[3], (2, 8, 8, 128), dtype=jnp.float32)
    w2, b2 = affine(keys[4], keys[5], 128)
    y2 = jax.block_until_ready(layer_norm(x2, w2, b2, eps, "channels_last"))
    r2 = _ref_channels_last(x2, w2, b2, eps)
    assert y2.shape == x2.shape and y2.dtype == x2.dtype
    assert jnp.allclose(y2, r2, atol=1e-5, rtol=1e-5)

    # 3) channels_first, C=4 -> sublane-packed (B*C, S) seg-dot path
    x3 = jax.random.normal(keys[6], (2, 4, 16, 16), dtype=jnp.float32)
    w3, b3 = affine(keys[7], keys[8], 4)
    y3 = jax.block_until_ready(layer_norm(x3, w3, b3, eps, "channels_first"))
    r3 = _ref_channels_first(x3, w3, b3, eps)
    assert y3.shape == x3.shape and y3.dtype == x3.dtype
    assert jnp.allclose(y3, r3, atol=1e-5, rtol=1e-5)

    # 4) channels_first, C=16 -> generic (B, C, S) path
    x4 = jax.random.normal(keys[9], (2, 16, 16, 16), dtype=jnp.float32)
    w4, b4 = affine(keys[10], keys[11], 16)
    y4 = jax.block_until_ready(layer_norm(x4, w4, b4, eps, "channels_first"))
    r4 = _ref_channels_first(x4, w4, b4, eps)
    assert y4.shape == x4.shape and y4.dtype == x4.dtype
    assert jnp.allclose(y4, r4, atol=1e-5, rtol=1e-5)

    print("KERNEL_OK")
</pallas_src>

<mosaic_0001>
module attributes {stable_mosaic.version = 11 : i64} {
  func.func @_ln_last_packed_kernel(%arg0: i32, %arg1: memref<64x128xf32, #tpu.memory_space<vmem>>, %arg2: memref<1x128xf32, #tpu.memory_space<vmem>>, %arg3: memref<1x128xf32, #tpu.memory_space<vmem>>, %arg4: memref<128x128xf32, #tpu.memory_space<vmem>>, %arg5: memref<64x128xf32, #tpu.memory_space<vmem>>) attributes {dimension_semantics = [#tpu.dimension_semantics<parallel>], iteration_bounds = array<i64: 2>, scalar_prefetch = 0 : i64, scratch_operands = 0 : i64, tpu.core_type = #tpu.core_type<tc>, window_params = [{transform_indices = @transform_0, window_bounds = array<i64: 64, 128>}, {pipeline_mode = #tpu.pipeline_mode<synchronous>, transform_indices = @transform_1, window_bounds = array<i64: 1, 128>}, {pipeline_mode = #tpu.pipeline_mode<synchronous>, transform_indices = @transform_2, window_bounds = array<i64: 1, 128>}, {pipeline_mode = #tpu.pipeline_mode<synchronous>, transform_indices = @transform_3, window_bounds = array<i64: 128, 128>}, {transform_indices = @transform_4, window_bounds = array<i64: 64, 128>}]} {
    %c0 = arith.constant 0 : index
    %c0_0 = arith.constant 0 : index
    %0 = vector.load %arg1[%c0, %c0_0] : memref<64x128xf32, #tpu.memory_space<vmem>>, vector<64x128xf32>
    %c0_1 = arith.constant 0 : index
    %c0_2 = arith.constant 0 : index
    %1 = vector.load %arg4[%c0_1, %c0_2] : memref<128x128xf32, #tpu.memory_space<vmem>>, vector<128x128xf32>
    %cst = arith.constant dense<0.000000e+00> : vector<64x128xf32>
    %2 = tpu.matmul %0, %1, %cst {dimension_numbers = #tpu.dot_dimension_numbers<[1], [0], [0], [1], [0, 0, 1, 1], [], []>, precision = #tpu.contract_precision<fp32>} : vector<64x128xf32>, vector<128x128xf32>, vector<64x128xf32> -> vector<64x128xf32>
    %3 = arith.subf %0, %2 : vector<64x128xf32>
    %4 = arith.mulf %3, %3 : vector<64x128xf32>
    %cst_3 = arith.constant dense<0.000000e+00> : vector<64x128xf32>
    %5 = tpu.matmul %4, %1, %cst_3 {dimension_numbers = #tpu.dot_dimension_numbers<[1], [0], [0], [1], [0, 0, 1, 1], [], []>, precision = #tpu.contract_precision<fp32>} : vector<64x128xf32>, vector<128x128xf32>, vector<64x128xf32> -> vector<64x128xf32>
    %cst_4 = arith.constant 9.99999997E-7 : f32
    %6 = vector.broadcast %cst_4 : f32 to vector<64x128xf32>
    %7 = arith.addf %5, %6 : vector<64x128xf32>
    %8 = math.rsqrt %7 : vector<64x128xf32>
    %9 = arith.mulf %3, %8 : vector<64x128xf32>
    %c0_5 = arith.constant 0 : index
    %c0_6 = arith.constant 0 : index
    %10 = vector.load %arg2[%c0_5, %c0_6] : memref<1x128xf32, #tpu.memory_space<vmem>>, vector<1x128xf32>
    %11 = vector.broadcast %10 : vector<1x128xf32> to vector<64x128xf32>
    %12 = arith.mulf %9, %11 : vector<64x128xf32>
    %c0_7 = arith.constant 0 : index
    %c0_8 = arith.constant 0 : index
    %13 = vector.load %arg3[%c0_7, %c0_8] : memref<1x128xf32, #tpu.memory_space<vmem>>, vector<1x128xf32>
    %14 = vector.broadcast %13 : vector<1x128xf32> to vector<64x128xf32>
    %15 = arith.addf %12, %14 : vector<64x128xf32>
    %c0_9 = arith.constant 0 : index
    %c0_10 = arith.constant 0 : index
    %16 = vector.load %arg5[%c0_9, %c0_10] : memref<64x128xf32, #tpu.memory_space<vmem>>, vector<64x128xf32>
    tpu.vector_store %arg5[%c0_9, %c0_10], %15 {strides = array<i32>} : memref<64x128xf32, #tpu.memory_space<vmem>>, vector<64x128xf32>,
    return
  }
  func.func @transform_0(%arg0: i32) -> (i32, i32) {
    %c0_i32 = arith.constant 0 : i32
    %c0_i32_0 = arith.constant 0 : i32
    return %arg0, %c0_i32 : i32, i32
  }
  func.func @transform_1(%arg0: i32) -> (i32, i32) {
    %c0_i32 = arith.constant 0 : i32
    %c0_i32_0 = arith.constant 0 : i32
    %c0_i32_1 = arith.constant 0 : i32
    return %c0_i32, %c0_i32_0 : i32, i32
  }
  func.func @transform_2(%arg0: i32) -> (i32, i32) {
    %c0_i32 = arith.constant 0 : i32
    %c0_i32_0 = arith.constant 0 : i32
    %c0_i32_1 = arith.constant 0 : i32
    return %c0_i32, %c0_i32_0 : i32, i32
  }
  func.func @transform_3(%arg0: i32) -> (i32, i32) {
    %c0_i32 = arith.constant 0 : i32
    %c0_i32_0 = arith.constant 0 : i32
    %c0_i32_1 = arith.constant 0 : i32
    return %c0_i32, %c0_i32_0 : i32, i32
  }
  func.func @transform_4(%arg0: i32) -> (i32, i32) {
    %c0_i32 = arith.constant 0 : i32
    %c0_i32_0 = arith.constant 0 : i32
    return %arg0, %c0_i32 : i32, i32
  }
}

</mosaic_0001>

<bundles_post_ra>
// kernel: tpu_custom_call.1
= control target key start
LH: loop header
LB: loop body
LE: loop exit
PB: predicated region body
PF: predicated region fallthrough
CT: control target
= control target key end

     0   :  { %s2719_s0 = inlined_call_operand.hbm [shape: f32[128,128], index: 0, kind: input, shape index: {}]   ;;  %s2720_s1 = inlined_call_operand.hbm [shape: f32[1,128], index: 1, kind: input, shape index: {}]   ;;  %s2721_s2 = inlined_call_operand.vmem [shape: f32[1,128], index: 2, kind: input, shape index: {}]   ;;  %s2722_s3 = inlined_call_operand.hbm [shape: f32[128,128], index: 3, kind: input, shape index: {}]   ;;  %s2723_s4 = inlined_call_operand.hbm [shape: f32[128,128], index: 4, kind: output, shape index: {}]  }
   0x1   :  { %2741 = sst [smem:[#allocation30_spill]] %s2720_s1 }
   0x2   :  { %2742 = sst [smem:[#allocation31_spill]] %s2722_s3 }
   0x3   :  { %9 = vsyncpa [#allocation3], 0 }
   0x4   :  { %11 = vsyncpa [#allocation3 + $0x1], 0 }
   0x5   :  { %12 = vsyncpa [#allocation6], 0 }
   0x6   :  { %13 = vsyncpa [#allocation4], 0 }
   0x7   :  { %15 = vsyncpa [#allocation4 + $0x1], 0  ;;  %s1937_s15 = smov 0   ;;  %s1939_s16 = smov 0  }
   0x8   :  { %s1941_s17 = smov 0   ;;  %s1943_s18 = smov 0  }
   0x9 LB: > { %s1958_s19 = sadd.s32 4294967295, %s1904_s18   ;;  %s1635_s20 = sadd.s32 4294967294, %s1904_s18   ;;  %s1904_s18 = sphi %s1943_s18, %s2791_s18   ;;  %s1900_s17 = sphi %s1941_s17, %s2790_s17   ;;  %s1896_s16 = sphi %s1939_s16, %s2789_s16   ;;  %s1892_s15 = sphi %s1937_s15, %s2788_s15  }
   0xa   : > { %s1962_s21 = sadd.s32 1, %s1904_s18   ;;  %s28_s22 = sadd.s32 1, %s1900_s17 }
   0xb   : > { %s25_s23 = ssub.s32 %s1904_s18, %s1962_s21  ;;  %p35_p0 = scmp.ne.s32.totalorder %s1900_s17, %s1896_s16 }
   0xc   : > { %p26_p1 = scmp.eq.s32.totalorder %s25_s23, 0  ;;  %p36_p2 = scmp.eq.s32.totalorder %s1904_s18, 0 }
   0xd   : > { %p41_p3 = scmp.ne.s32.totalorder %s1896_s16, %s1892_s15  ;;  %p42_p4 = scmp.eq.s32.totalorder %s1958_s19, 0 }
   0xe   : > { %s1974_s24 = scalar_select %p26_p1, %s1900_s17, %s28_s22  }
   0xf   : > { %p1976_p5 = por %p36_p2, %p35_p0  ;;  %p1982_p6 = por %p42_p4, %p41_p3 }
  0x10   : > { %2743 = sst [smem:[#allocation12_spill]] %s1974_s24  ;;  %p128_p7 = scmp.eq.s32.totalorder %s1958_s19, 1 }
  0x11   : > { %p134_p8 = scmp.eq.s32.totalorder %s1635_s20, 1  ;;  %p1636_p9 = scmp.ge.s32.totalorder %s1904_s18, 1 }
  0x12   : > { %p141_p10 = scmp.lt.s32.totalorder %s1904_s18, 3  ;;  %p1989_p11 = por %p128_p7, %p35_p0 }
  0x13   : > { %p1993_p12 = por %p134_p8, %p41_p3  ;;  %s2749_s1 = sld [smem:[#allocation30_spill]] }
  0x14   : > { %p1997_p13 = pnand %p1636_p9, %p141_p10  ;;  %s1906_s7 = smov [#allocation5]  }
  0x15   : > { %s155_s8 = sshll.u32 %s1906_s7, 4  ;;  %p1684_p3 = scmp.lt.s32.totalorder %s1904_s18, 2  ;;  %s156_s8 = int_to_ptr.vmem [resolvable:$true] %s155_s8 }
  0x16   : > { %p1667_p1 = pneg %p1997_p13  ;;  %s2750_s3 = sld [smem:[#allocation31_spill]] }
  0x17   : > { %p2015_p7 = pnand %p1684_p3, %p1976_p5  ;;  %s1907_s13 = smov [#allocation7]  }
  0x18   : > { %p1668_p2 = pnand %p1667_p1, %p42_p4  ;;  %s169_s14 = sshll.u32 %s1907_s13, 4  ;;  %s170_s14 = int_to_ptr.vmem [resolvable:$true] %s169_s14 }
  0x19   : > { %s153_s6 = sshll.u32 %s2749_s1, 4  ;;  %s183_s20 = sand.u32 1, %s1900_s17   ;;  %s154_s6 = int_to_ptr.hbm [resolvable:$true] %s153_s6 }
  0x1a   : > { %1670 = dma.hbm_to_vmem [thread:$0]  (!%p1668_p2), %s154_s6, 16, %s156_s8, [#allocation6]  }
  0x1b   : > { %s1908_s22 = smov 128   ;;  %s1909_s23 = smov 8  }
  0x1c   : > { %s167_s11 = sshll.u32 %s2750_s3, 4  ;;  %s1640_s30 = sshll.u32 %s183_s20, 6  ;;  %s168_s11 = int_to_ptr.hbm [resolvable:$true] %s167_s11 }
  0x1d   : > { %1673 = dma.hbm_to_vmem [thread:$0]  (!%p1668_p2), %s168_s11, 2048, %s170_s14, [#allocation6], %s1908_s22, %s1908_s22, %s1909_s23  }
  0x1e   : > { %s1653_s5 = sshll.u32 %s1904_s18, 6  ;;  %s187_s6 = scalar_lea.vmem [#allocation2], %s1640_s30 }
  0x1f   : > { %s192_s10 = scalar_lea.hbm %s2719_s0, %s1653_s5  ;;  %s195_s25 = sshll.u32 %s187_s6, 4  ;;  %s196_s25 = int_to_ptr.vmem [resolvable:$true] %s195_s25 }
  0x20   : > { %s193_s8 = sshll.u32 %s192_s10, 4  ;;  %s184_s1 = scalar_lea.sflag [#allocation3], %s183_s20  ;;  %s194_s8 = int_to_ptr.hbm [resolvable:$true] %s193_s8 }
  0x21   : > { %s1804_s3 = sshra.s32 %s194_s8, 4  ;;  %p1808_p8 = pneg %p2015_p7  ;;  %s1805_s3 = int_to_ptr.hbm [resolvable:$true] %s1804_s3 }
  0x22   : > { %s1806_s13 = scalar_lea.hbm %s1805_s3, 64  ;;  %s1811_s24 = scalar_lea.hbm %s2719_s0, 128 }
  0x23   : > { %p1807_p5 = scmp.ne.s32.totalorder %s1805_s3, %s1806_s13  ;;  %p1812_p1 = scmp.lt.s32.totalorder %s1805_s3, %s2719_s0 }
  0x24   : > { %p1813_p2 = scmp.lt.s32.totalorder %s1811_s24, %s1806_s13 }
  0x25   : > { %p1809_p9 = pnand %p1808_p8, %p1807_p5 }
  0x26   : > { %p1814_p3 = por %p1813_p2, %p1812_p1 }
  0x27   : > { %p1810_p10 = pneg %p1809_p9 }
  0x29   : > { %p1815_p0 = pnand %p1814_p3, %p1810_p10 }
  0x2b   : > { %1818 = shalt.err (!%p1815_p0)
}
  0x2c   : > { %1677 = dma.hbm_to_vmem [thread:$0]  (!%p2015_p7), %s194_s8, 1024, %s196_s25, %s184_s1, %s1908_s22, %s1908_s22, %s1909_s23  }
  0x2d   : > { %207 = sbr.rel (%p1997_p13) target bundleno = 589 (0x24d), region = 36 }
  0x32   : > { %s2037_s20 = sand.u32 1, %s1896_s16  }
  0x33   : > { %s1644_s30 = sshll.u32 %s2037_s20, 6  ;;  %s210_s9 = scalar_lea.sflag [#allocation3], %s2037_s20 }
  0x34   : > { %s2043_s3 = scalar_lea.vmem [#allocation2], %s1644_s30 }
  0x35   : > { %1879 = dma.done.wait (%p1982_p6), %s210_s9, 1024  }
  0x36   : > { %1881 = vsyncadd (%p1982_p6), %s210_s9, 4294966272 }
  0x37   : > { %1883 = dma.done.wait (%p42_p4), [#allocation6], 2064  }
  0x38   : > { %1885 = vsyncadd (%p42_p4), [#allocation6], 4294965232  ;;  %v274_v0 = vld [vmem:[#allocation7 + $0x78] sm:$0xff]  ;;  %v273_v1 = vld [vmem:[#allocation7 + $0x70] sm:$0xff]  ;;  %s2649_s26 = scalar_lea.vmem [#allocation8], %s1644_s30  ;;  %s1654_s29 = sshll.u32 %s1958_s19, 6 }
  0x39   : > { %v272_v2 = vld [vmem:[#allocation7 + $0x68] sm:$0xff]  ;;  %v2053_v3 = vand.u32 4294901760, %v274_v0  ;;  %v2055_v4 = vand.u32 4294901760, %v273_v1  ;;  %v271_v6 = vld [vmem:[#allocation7 + $0x60] sm:$0xff]  ;;  %v270_v7 = vld [vmem:[#allocation7 + $0x58] sm:$0xff]  ;;  %s1539_s23 = scalar_lea.hbm %s2723_s4, %s1654_s29  ;;  %s1540_s10 = sshll.u32 %s2649_s26, 4  ;;  %s1541_s10 = int_to_ptr.vmem [resolvable:$true] %s1540_s10 }
  0x3a   : > { %v2057_v5 = vand.u32 4294901760, %v272_v2  ;;  %v269_v8 = vld [vmem:[#allocation7 + $0x50] sm:$0xff]  ;;  %v2059_v9 = vand.u32 4294901760, %v271_v6  ;;  %v2061_v10 = vand.u32 4294901760, %v270_v7  ;;  %v268_v12 = vld [vmem:[#allocation7 + $0x48] sm:$0xff]  ;;  %v267_v13 = vld [vmem:[#allocation7 + $0x40] sm:$0xff] }
  0x3b   : > { %v2063_v11 = vand.u32 4294901760, %v269_v8  ;;  %276 = vmatpush.msra.mxu0 %v2053_v3  ;;  %v2067_v14 = vsub.f32 %v274_v0, %v2053_v3  ;;  %v2070_v15 = vsub.f32 %v273_v1, %v2055_v4  ;;  %591 = vmatpush.msra.mxu3 %v2053_v3  ;;  %v2076_v17 = vand.u32 4294901760, %v268_v12  ;;  %v266_v18 = vld [vmem:[#allocation7 + $0x38] sm:$0xff]  ;;  %v265_v29 = vld [vmem:[#allocation7 + $0x30] sm:$0xff]  ;;  %v264_v36 = vld [vmem:[#allocation7 + $0x28] sm:$0xff]  ;;  %s1542_s19 = sshll.u32 %s1539_s23, 4  ;;  %s1543_s19 = int_to_ptr.hbm [resolvable:$true] %s1542_s19 }
  0x3c   : > { %v2074_v16 = vsub.f32 %v272_v2, %v2057_v5  ;;  %v2079_v19 = vsub.f32 %v271_v6, %v2059_v9  ;;  %v2082_v20 = vsub.f32 %v270_v7, %v2061_v10  ;;  %v2084_v21 = vand.u32 4294901760, %v267_v13  ;;  %v263_v43 = vld [vmem:[#allocation7 + $0x20] sm:$0xff]  ;;  %v262_v49 = vld [vmem:[#allocation7 + $0x18] sm:$0xff]  ;;  %v261_v55 = vld [vmem:[#allocation7 + $0x10] sm:$0xff]  ;;  %s1528_s6 = scalar_lea.sflag [#allocation4], %s2037_s20  ;;  %s1848_s25 = sshra.s32 %s1543_s19, 4  ;;  %s1849_s25 = int_to_ptr.hbm [resolvable:$true] %s1848_s25 }
  0x3d   : > { %2752 = vst [vmem:[#allocation13_spill] sm:$0xff] %v2070_v15  ;;  %v2087_v22 = vsub.f32 %v269_v8, %v2063_v11  ;;  %278 = vmatpush.msra.mxu0 %v2055_v4  ;;  %503 = vmatpush.msra.mxu2 %v2067_v14  ;;  %v2092_v23 = vand.u32 4294901760, %v2067_v14  ;;  %v2095_v24 = vand.u32 4294901760, %v2070_v15  ;;  %v2104_v27 = vand.u32 4294901760, %v266_v18  ;;  %v2176_v56 = vld [vmem:[%s2043_s3] sm:$0xff]  ;;  %v260_v62 = vld [vmem:[#allocation7 + $0x8] sm:$0xff]  ;;  %p1855_p0 = scmp.lt.s32.totalorder %s1849_s25, %s2723_s4 }
  0x3e   : > { %2753 = vst [vmem:[#allocation14_spill] sm:$0xff] %v2074_v16  ;;  %v2098_v25 = vand.u32 4294901760, %v2074_v16  ;;  %593 = vmatpush.msra.mxu3 %v2055_v4  ;;  %v2102_v26 = vand.u32 4294901760, %v2079_v19  ;;  %v2107_v28 = vsub.f32 %v268_v12, %v2076_v17  ;;  %v2118_v33 = vand.u32 4294901760, %v2082_v20  ;;  %v259_v8 = vld [vmem:[#allocation7] sm:$0xff]  ;;  %s1850_s8 = scalar_lea.hbm %s1849_s25, 64 }
  0x3f   : > { %2754 = vst [vmem:[#allocation15_spill] sm:$0xff] %v2079_v19  ;;  %280 = vmatpush.msra.mxu0 %v2057_v5  ;;  %506 = vmatpush.msra.mxu2 %v2070_v15  ;;  %v375_v30 = vsub.f32 %v2067_v14, %v2092_v23  ;;  %v381_v31 = vsub.f32 %v2070_v15, %v2095_v24  ;;  %v2122_v34 = vand.u32 4294901760, %v2087_v22  ;;  %v2135_v40 = vand.u32 4294901760, %v265_v29  ;;  %v2332_v15 = vld [vmem:[%s2043_s3 + $0x18] sm:$0xff]  ;;  %p1851_p4 = scmp.ne.s32.totalorder %s1849_s25, %s1850_s8  ;;  %s1854_s14 = scalar_lea.hbm %s2723_s4, 128 }
  0x40   : > { %2755 = vst [vmem:[#allocation16_spill] sm:$0xff] %v2082_v20  ;;  %v387_v32 = vsub.f32 %v2074_v16, %v2098_v25  ;;  %595 = vmatpush.msra.mxu3 %v2057_v5  ;;  %v2125_v35 = vsub.f32 %v267_v13, %v2084_v21  ;;  %v393_v39 = vsub.f32 %v2079_v19, %v2102_v26  ;;  %v2139_v41 = vand.u32 4294901760, %v2107_v28  ;;  %p1856_p7 = scmp.lt.s32.totalorder %s1854_s14, %s1850_s8 }
  0x41   : > { %2756 = vst [vmem:[#allocation17_spill] sm:$0xff] %v2087_v22  ;;  %282 = vmatpush.msra.mxu0 %v2059_v9  ;;  %v2128_v37 = vand.u32 4294901760, %v375_v30  ;;  %509 = vmatpush.msra.mxu2 %v2074_v16  ;;  %v2131_v38 = vand.u32 4294901760, %v381_v31  ;;  %v2142_v42 = vsub.f32 %v266_v18, %v2104_v27  ;;  %v399_v45 = vsub.f32 %v2082_v20, %v2118_v33  ;;  %v2227_v30 = vld [vmem:[%s2043_s3 + $0x8] sm:$0xff]  ;;  %p1852_p6 = pnand %p1851_p4, %p1989_p11 }
  0x42   : > { %2757 = vst [vmem:[#allocation18_spill] sm:$0xff] %v2107_v28  ;;  %597 = vmatpush.msra.mxu3 %v2059_v9  ;;  %v2146_v44 = vand.u32 4294901760, %v387_v32  ;;  %v2150_v46 = vand.u32 4294901760, %v264_v36  ;;  %v405_v47 = vsub.f32 %v2087_v22, %v2122_v34  ;;  %v2157_v48 = vand.u32 4294901760, %v2125_v35  ;;  %p1857_p5 = por %p1856_p7, %p1855_p0 }
  0x43   : > { %2758 = vst [vmem:[#allocation19_spill] sm:$0xff] %v2125_v35  ;;  %284 = vmatpush.msra.mxu0 %v2061_v10  ;;  %377 = vmatpush.msra.mxu1 %v2128_v37  ;;  %v2161_v50 = vand.u32 4294901760, %v393_v39  ;;  %v2163_v51 = vand.u32 4294901760, %v263_v43  ;;  %v2166_v52 = vsub.f32 %v265_v29, %v2135_v40  ;;  %v411_v53 = vsub.f32 %v2107_v28, %v2139_v41  ;;  %p1853_p13 = pneg %p1852_p6 }
  0x44   : > { %2759 = vst [vmem:[#allocation20_spill] sm:$0xff] %v2142_v42  ;;  %512 = vmatpush.msra.mxu2 %v2079_v19  ;;  %599 = vmatpush.msra.mxu3 %v2061_v10  ;;  %v2173_v54 = vand.u32 4294901760, %v2142_v42  ;;  %v2180_v57 = vand.u32 4294901760, %v399_v45  ;;  %v2182_v58 = vand.u32 4294901760, %v262_v49  ;;  %v2185_v59 = vsub.f32 %v264_v36, %v2150_v46 }
  0x45   : > { %286 = vmatpush.msra.mxu0 %v2063_v11  ;;  %383 = vmatpush.msra.mxu1 %v2131_v38  ;;  %2760 = vst [vmem:[#allocation21_spill] sm:$0xff] %v2166_v52  ;;  %v2188_v60 = vand.u32 4294901760, %v405_v47  ;;  %v417_v61 = vsub.f32 %v2125_v35, %v2157_v48  ;;  %v2195_v63 = vand.u32 4294901760, %v261_v55  ;;  %v2198_v0 = vand.u32 4294901760, %v2166_v52  ;;  %p1858_p8 = pnand %p1857_p5, %p1853_p13 }
  0x46   : > { %515 = vmatpush.msra.mxu2 %v2082_v20  ;;  %601 = vmatpush.msra.mxu3 %v2063_v11  ;;  %2761 = vst [vmem:[#allocation22_spill] sm:$0xff] %v2176_v56  ;;  %v2201_v1 = vsub.f32 %v263_v43, %v2163_v51  ;;  %v2204_v2 = vand.u32 4294901760, %v2176_v56  ;;  %v2207_v6 = vand.u32 4294901760, %v411_v53  ;;  %v423_v7 = vsub.f32 %v2142_v42, %v2173_v54 }
  0x47   : > { %288 = vmatpush.msra.mxu0 %v2076_v17  ;;  %389 = vmatpush.msra.mxu1 %v2146_v44  ;;  %2762 = vst [vmem:[#allocation23_spill] sm:$0xff] %v2185_v59  ;;  %v2214_v12 = vand.u32 4294901760, %v260_v62  ;;  %v2217_v13 = vand.u32 4294901760, %v2185_v59  ;;  %v2220_v18 = vsub.f32 %v262_v49, %v2182_v58  ;;  %v2230_v31 = vand.u32 4294901760, %v417_v61 }
  0x48   : > { %518 = vmatpush.msra.mxu2 %v2087_v22  ;;  %603 = vmatpush.msra.mxu3 %v2076_v17  ;;  %2763 = vst [vmem:[#allocation24_spill] sm:$0xff] %v2201_v1  ;;  %v2224_v29 = vsub.f32 %v2176_v56, %v2204_v2  ;;  %v429_v32 = vsub.f32 %v2166_v52, %v2198_v0  ;;  %v2237_v36 = vand.u32 4294901760, %v259_v8  ;;  %v2240_v39 = vand.u32 4294901760, %v2201_v1 }
  0x49   : > { %290 = vmatpush.msra.mxu0 %v2084_v21  ;;  %395 = vmatpush.msra.mxu1 %v2161_v50  ;;  %2764 = vst [vmem:[#allocation25_spill] sm:$0xff] %v2220_v18  ;;  %v2243_v43 = vsub.f32 %v261_v55, %v2195_v63  ;;  %v2249_v47 = vand.u32 4294901760, %v2227_v30  ;;  %v2253_v49 = vand.u32 4294901760, %v423_v7  ;;  %v435_v53 = vsub.f32 %v2185_v59, %v2217_v13 }
  0x4a   : > { %521 = vmatpush.msra.mxu2 %v2107_v28  ;;  %605 = vmatpush.msra.mxu3 %v2084_v21  ;;  %2765 = vst [vmem:[#allocation26_spill] sm:$0xff] %v2227_v30  ;;  %v309_v45 = vand.u32 4294901760, %v2224_v29  ;;  %v2258_v55 = vand.u32 4294901760, %v2220_v18  ;;  %v2261_v61 = vsub.f32 %v260_v62, %v2214_v12  ;;  %v2267_v7 = vand.u32 4294901760, %v429_v32 }
  0x4b   : > { %292 = vmatpush.msra.mxu0 %v2104_v27  ;;  %401 = vmatpush.msra.mxu1 %v2180_v57  ;;  %2766 = vst [vmem:[#allocation27_spill] sm:$0xff] %v2243_v43  ;;  %v441_v56 = vsub.f32 %v2201_v1, %v2240_v39  ;;  %v2275_v62 = vsub.f32 %v259_v8, %v2237_v36  ;;  %v2284_v32 = vand.u32 4294901760, %v435_v53 }
  0x4c   : > { %524 = vmatpush.msra.mxu2 %v2125_v35  ;;  %607 = vmatpush.msra.mxu3 %v2104_v27  ;;  %v316_v35 = vsub.f32 %v2227_v30, %v2249_v47  ;;  %v447_v28 = vsub.f32 %v2220_v18, %v2258_v55  ;;  %v2289_v8 = vand.u32 4294901760, %v2261_v61 }
  0x4d   : > { %294 = vmatpush.msra.mxu0 %v2135_v40  ;;  %407 = vmatpush.msra.mxu1 %v2188_v60  ;;  %2767 = vst [vmem:[#allocation28_spill] sm:$0xff] %v2284_v32  ;;  %v2298_v30 = vand.u32 4294901760, %v441_v56  ;;  %v2303_v22 = vand.u32 4294901760, %v2275_v62 }
  0x4e   : > { %527 = vmatpush.msra.mxu2 %v2142_v42  ;;  %609 = vmatpush.msra.mxu3 %v2135_v40  ;;  %v2272_v42 = vand.u32 4294901760, %v2243_v43  ;;  %v2312_v56 = vand.u32 4294901760, %v447_v28  ;;  %v459_v16 = vsub.f32 %v2261_v61, %v2289_v8 }
  0x4f   : > { %296 = vmatpush.msra.mxu0 %v2150_v46  ;;  %413 = vmatpush.msra.mxu1 %v2207_v6 }
  0x50   : > { %530 = vmatpush.msra.mxu2 %v2166_v52  ;;  %611 = vmatpush.msra.mxu3 %v2150_v46  ;;  %v310_v52 = vsub.f32 %v2224_v29, %v309_v45  ;;  %v453_v53 = vsub.f32 %v2243_v43, %v2272_v42 }
  0x51   : > { %298 = vmatpush.msra.mxu0 %v2163_v51  ;;  %419 = vmatpush.msra.mxu1 %v2230_v31 }
  0x52   : > { %533 = vmatpush.msra.mxu2 %v2185_v59  ;;  %613 = vmatpush.msra.mxu3 %v2163_v51  ;;  %v2292_v59 = vld [vmem:[%s2043_s3 + $0x10] sm:$0xff]  ;;  %v311_v20 = vand.u32 4294901760, %v310_v52  ;;  %v2320_v52 = vand.u32 4294901760, %v453_v53 }
  0x53   : > { %300 = vmatpush.msra.mxu0 %v2182_v58  ;;  %425 = vmatpush.msra.mxu1 %v2253_v49  ;;  %2768 = vst [vmem:[#allocation29_spill] sm:$0xff] %v2292_v59  ;;  %v2308_v19 = vand.u32 4294901760, %v2292_v59 }
  0x54   : > { %536 = vmatpush.msra.mxu2 %v2201_v1  ;;  %615 = vmatpush.msra.mxu3 %v2182_v58  ;;  %v317_v1 = vand.u32 4294901760, %v316_v35 }
  0x55   : > { %302 = vmatpush.msra.mxu0 %v2195_v63  ;;  %431 = vmatpush.msra.mxu1 %v2267_v7 }
  0x56   : > { %539 = vmatpush.msra.mxu2 %v2220_v18  ;;  %617 = vmatpush.msra.mxu3 %v2195_v63  ;;  %v465_v18 = vsub.f32 %v2275_v62, %v2303_v22  ;;  %v318_v28 = vsub.f32 %v316_v35, %v317_v1 }
  0x57   : > { %304 = vmatpush.msra.mxu0 %v2214_v12  ;;  %437 = vmatpush.msra.mxu1 %v2284_v32  ;;  %v324_v32 = vsub.f32 %v2292_v59, %v2308_v19 }
  0x58   : > { %542 = vmatpush.msra.mxu2 %v2243_v43  ;;  %619 = vmatpush.msra.mxu3 %v2214_v12  ;;  %v2328_v43 = vand.u32 4294901760, %v459_v16  ;;  %v319_v53 = vand.u32 4294901760, %v318_v28  ;;  %v2341_v16 = vand.u32 4294901760, %v2332_v15 }
  0x59   : > { %306 = vmatpush.msra.mxu0 %v2237_v36  ;;  %443 = vmatpush.msra.mxu1 %v2298_v30  ;;  %v325_v59 = vand.u32 4294901760, %v324_v32 }
  0x5a   : > { %312 = vmatmul.f32.vlgmr.msra.gmra.mxu0 %v311_v20  ;;  %545 = vmatpush.msra.mxu2 %v2261_v61  ;;  %v2337_v20 = vand.u32 4294901760, %v465_v18 }
  0x5b   : > { %449 = vmatpush.msra.mxu1 %v2312_v56  ;;  %621 = vmatpush.msra.mxu3 %v2237_v36  ;;  %v326_v18 = vsub.f32 %v324_v32, %v325_v59 }
  0x5c   : > { %548 = vmatpush.msra.mxu2 %v2275_v62  ;;  %625 = vmatmul.f32.vlgmr.msra.gmra.mxu3 %v309_v45 }
  0x5d   : > { %455 = vmatpush.msra.mxu1 %v2320_v52  ;;  %551 = vmatmul.f32.vlgmr.msra.gmra.mxu2 %v2224_v29  ;;  %v332_v29 = vsub.f32 %v2332_v15, %v2341_v16 }
  0x5e   : > { %674 = vmatpush.msrb.mxu0 %v2092_v23  ;;  %850 = vmatpush.msrb.mxu2 %v2053_v3 }
  0x5f   : > { %461 = vmatpush.msra.mxu1 %v2328_v43  ;;  %951 = vmatpush.msrb.mxu3 %v2128_v37  ;;  %v2356_v37 = vld [vmem:[%s2043_s3 + $0x20] sm:$0xff]  ;;  %v333_v45 = vand.u32 4294901760, %v332_v29 }
  0x60   : > { %678 = vmatpush.msrb.mxu0 %v2095_v24  ;;  %852 = vmatpush.msrb.mxu2 %v2055_v4  ;;  %v2362_v28 = vand.u32 4294901760, %v2356_v37 }
  0x61   : > { %467 = vmatpush.msra.mxu1 %v2337_v20  ;;  %957 = vmatpush.msrb.mxu3 %v2131_v38  ;;  %v327_v38 = vand.u32 4294901760, %v326_v18 }
  0x62   : > { %320 = vmatmul.f32.gmra.mxu0 %v319_v53  ;;  %469 = vmatmul.f32.vlgmr.msra.gmra.mxu1 %v2204_v2 }
  0x63   : > { %769 = vmatpush.msrb.mxu1 %v2053_v3  ;;  %682 = vmatpush.msrb.mxu0 %v2098_v25 }
  0x64   : > { %631 = vmatmul.f32.gmra.mxu3 %v317_v1  ;;  %854 = vmatpush.msrb.mxu2 %v2057_v5  ;;  %v340_v1 = vsub.f32 %v2356_v37, %v2362_v28 }
  0x65   : > { %556 = vmatmul.f32.gmra.mxu2 %v316_v35  ;;  %771 = vmatpush.msrb.mxu1 %v2055_v4  ;;  %v334_v35 = vsub.f32 %v332_v29, %v333_v45 }
  0x66   : > { %686 = vmatpush.msrb.mxu0 %v2102_v26  ;;  %963 = vmatpush.msrb.mxu3 %v2146_v44  ;;  %v2377_v44 = vld [vmem:[%s2043_s3 + $0x28] sm:$0xff]  ;;  %v341_v53 = vand.u32 4294901760, %v340_v1 }
  0x67   : > { %773 = vmatpush.msrb.mxu1 %v2057_v5  ;;  %856 = vmatpush.msrb.mxu2 %v2059_v9  ;;  %v2383_v18 = vand.u32 4294901760, %v2377_v44 }
  0x68   : > { %690 = vmatpush.msrb.mxu0 %v2118_v33  ;;  %969 = vmatpush.msrb.mxu3 %v2161_v50  ;;  %v335_v50 = vand.u32 4294901760, %v334_v35 }
  0x69   : > { %775 = vmatpush.msrb.mxu1 %v2059_v9  ;;  %858 = vmatpush.msrb.mxu2 %v2061_v10 }
  0x6a   : > { %328 = vmatmul.f32.gmra.mxu0 %v327_v38  ;;  %473 = vmatmul.f32.gmra.mxu1 %v2249_v47 }
  0x6b   : > { %777 = vmatpush.msrb.mxu1 %v2061_v10  ;;  %694 = vmatpush.msrb.mxu0 %v2122_v34 }
  0x6c   : > { %637 = vmatmul.f32.gmra.mxu3 %v325_v59  ;;  %860 = vmatpush.msrb.mxu2 %v2063_v11  ;;  %v342_v59 = vsub.f32 %v340_v1, %v341_v53 }
  0x6d   : > { %561 = vmatmul.f32.gmra.mxu2 %v324_v32  ;;  %779 = vmatpush.msrb.mxu1 %v2063_v11  ;;  %v348_v32 = vsub.f32 %v2377_v44, %v2383_v18 }
  0x6e   : > { %698 = vmatpush.msrb.mxu0 %v2139_v41  ;;  %975 = vmatpush.msrb.mxu3 %v2180_v57  ;;  %v2398_v57 = vld [vmem:[%s2043_s3 + $0x30] sm:$0xff] }
  0x6f   : > { %781 = vmatpush.msrb.mxu1 %v2076_v17  ;;  %862 = vmatpush.msrb.mxu2 %v2076_v17  ;;  %v349_v38 = vand.u32 4294901760, %v348_v32  ;;  %v2404_v35 = vand.u32 4294901760, %v2398_v57 }
  0x70   : > { %702 = vmatpush.msrb.mxu0 %v2157_v48  ;;  %981 = vmatpush.msrb.mxu3 %v2188_v60  ;;  %v343_v60 = vand.u32 4294901760, %v342_v59 }
  0x71   : > { %783 = vmatpush.msrb.mxu1 %v2084_v21  ;;  %864 = vmatpush.msrb.mxu2 %v2084_v21 }
  0x72   : > { %336 = vmatmul.f32.gmra.mxu0 %v335_v50  ;;  %477 = vmatmul.f32.gmra.mxu1 %v2308_v19 }
  0x73   : > { %706 = vmatpush.msrb.mxu0 %v2173_v54  ;;  %785 = vmatpush.msrb.mxu1 %v2104_v27 }
  0x74   : > { %643 = vmatmul.f32.gmra.mxu3 %v333_v45  ;;  %866 = vmatpush.msrb.mxu2 %v2104_v27  ;;  %v356_v45 = vsub.f32 %v2398_v57, %v2404_v35 }
  0x75   : > { %566 = vmatmul.f32.gmra.mxu2 %v332_v29  ;;  %710 = vmatpush.msrb.mxu0 %v2198_v0  ;;  %v350_v29 = vsub.f32 %v348_v32, %v349_v38 }
  0x76   : > { %787 = vmatpush.msrb.mxu1 %v2135_v40  ;;  %987 = vmatpush.msrb.mxu3 %v2207_v6  ;;  %v2419_v6 = vld [vmem:[%s2043_s3 + $0x38] sm:$0xff]  ;;  %v357_v50 = vand.u32 4294901760, %v356_v45 }
  0x77   : > { %714 = vmatpush.msrb.mxu0 %v2217_v13  ;;  %868 = vmatpush.msrb.mxu2 %v2135_v40  ;;  %v2424_v59 = vand.u32 4294901760, %v2419_v6 }
  0x78   : > { %789 = vmatpush.msrb.mxu1 %v2150_v46  ;;  %993 = vmatpush.msrb.mxu3 %v2230_v31  ;;  %v351_v31 = vand.u32 4294901760, %v350_v29  ;;  %v2770_v29 = vld [vmem:[#allocation28_spill] sm:$0xff] }
  0x79   : > { %718 = vmatpush.msrb.mxu0 %v2240_v39  ;;  %870 = vmatpush.msrb.mxu2 %v2150_v46 }
  0x7a   : > { %344 = vmatmul.f32.gmra.mxu0 %v343_v60  ;;  %481 = vmatmul.f32.gmra.mxu1 %v2341_v16  ;;  %v2769_v60 = vld [vmem:[#allocation13_spill] sm:$0xff] }
  0x7b   : > { %791 = vmatpush.msrb.mxu1 %v2163_v51  ;;  %722 = vmatpush.msrb.mxu0 %v2258_v55 }
  0x7c   : > { %649 = vmatmul.f32.gmra.mxu3 %v341_v53  ;;  %872 = vmatpush.msrb.mxu2 %v2163_v51  ;;  %v364_v53 = vsub.f32 %v2419_v6, %v2424_v59 }
  0x7d   : > { %571 = vmatmul.f32.gmra.mxu2 %v340_v1  ;;  %793 = vmatpush.msrb.mxu1 %v2182_v58  ;;  %v358_v1 = vsub.f32 %v356_v45, %v357_v50 }
  0x7e   : > { %726 = vmatpush.msrb.mxu0 %v2272_v42  ;;  %999 = vmatpush.msrb.mxu3 %v2253_v49 }
  0x7f   : > { %795 = vmatpush.msrb.mxu1 %v2195_v63  ;;  %874 = vmatpush.msrb.mxu2 %v2182_v58  ;;  %v359_v49 = vand.u32 4294901760, %v358_v1 }
  0x80   : > { %730 = vmatpush.msrb.mxu0 %v2289_v8  ;;  %1005 = vmatpush.msrb.mxu3 %v2267_v7  ;;  %v365_v7 = vand.u32 4294901760, %v364_v53 }
  0x81   : > { %797 = vmatpush.msrb.mxu1 %v2214_v12  ;;  %876 = vmatpush.msrb.mxu2 %v2195_v63 }
  0x82   : > { %352 = vmatmul.f32.gmra.mxu0 %v351_v31  ;;  %485 = vmatmul.f32.gmra.mxu1 %v2362_v28  ;;  %v2771_v31 = vld [vmem:[#allocation14_spill] sm:$0xff] }
  0x83   : > { %734 = vmatpush.msrb.mxu0 %v2303_v22  ;;  %799 = vmatpush.msrb.mxu1 %v2237_v36 }
  0x84   : > { %655 = vmatmul.f32.gmra.mxu3 %v349_v38  ;;  %878 = vmatpush.msrb.mxu2 %v2214_v12  ;;  %v2773_v38 = vld [vmem:[#allocation16_spill] sm:$0xff] }
  0x85   : > { %1077 = vmatpush.msra.mxu0 %v2067_v14  ;;  %576 = vmatmul.f32.gmra.mxu2 %v348_v32  ;;  %v366_v14 = vsub.f32 %v364_v53, %v365_v7  ;;  %v2772_v32 = vld [vmem:[#allocation15_spill] sm:$0xff] }
  0x86   : > { %1165 = vmatpush.msra.mxu1 %v2053_v3  ;;  %1011 = vmatpush.msrb.mxu3 %v2770_v29 }
  0x87   : > { %1080 = vmatpush.msra.mxu0 %v2769_v60  ;;  %880 = vmatpush.msrb.mxu2 %v2237_v36  ;;  %v367_v1 = vand.u32 4294901760, %v366_v14  ;;  %v2784_v14 = vld [vmem:[#allocation26_spill] sm:$0xff] }
  0x88   : > { %1167 = vmatpush.msra.mxu1 %v2055_v4  ;;  %1017 = vmatpush.msrb.mxu3 %v2298_v30  ;;  %v2774_v30 = vld [vmem:[#allocation17_spill] sm:$0xff] }
  0x89   : > { %1083 = vmatpush.msra.mxu0 %v2771_v31  ;;  %1248 = vmatpush.msra.mxu2 %v2092_v23  ;;  %v2776_v23 = vld [vmem:[#allocation19_spill] sm:$0xff] }
  0x8a   : > { %1169 = vmatpush.msra.mxu1 %v2057_v5  ;;  %360 = vmatmul.f32.gmra.mxu0 %v359_v49  ;;  %v2775_v49 = vld [vmem:[#allocation18_spill] sm:$0xff] }
  0x8b   : > { %489 = vmatmul.f32.gmra.mxu1 %v2383_v18  ;;  %1086 = vmatpush.msra.mxu0 %v2772_v32 }
  0x8c   : > { %1171 = vmatpush.msra.mxu1 %v2059_v9  ;;  %661 = vmatmul.f32.gmra.mxu3 %v357_v50 }
  0x8d   : > { %581 = vmatmul.f32.gmra.mxu2 %v356_v45  ;;  %1089 = vmatpush.msra.mxu0 %v2773_v38 }
  0x8e   : > { %1173 = vmatpush.msra.mxu1 %v2061_v10  ;;  %1023 = vmatpush.msrb.mxu3 %v2312_v56  ;;  %v2778_v56 = vld [vmem:[#allocation21_spill] sm:$0xff] }
  0x8f   : > { %1092 = vmatpush.msra.mxu0 %v2774_v30  ;;  %1252 = vmatpush.msra.mxu2 %v2095_v24  ;;  %v2777_v24 = vld [vmem:[#allocation20_spill] sm:$0xff] }
  0x90   : > { %1175 = vmatpush.msra.mxu1 %v2063_v11  ;;  %1029 = vmatpush.msrb.mxu3 %v2320_v52  ;;  %v2783_v52 = vld [vmem:[#allocation22_spill] sm:$0xff] }
  0x91   : > { %1095 = vmatpush.msra.mxu0 %v2775_v49  ;;  %1256 = vmatpush.msra.mxu2 %v2098_v25  ;;  %v2779_v25 = vld [vmem:[#allocation23_spill] sm:$0xff] }
  0x92   : > { %368 = vmatmul.f32.gmra.mxu0 %v367_v1  ;;  %1177 = vmatpush.msra.mxu1 %v2076_v17 }
  0x93   : > { %493 = vmatmul.f32.gmra.mxu1 %v2404_v35  ;;  %1098 = vmatpush.msra.mxu0 %v2776_v23 }
  0x94   : > { %667 = vmatmul.f32.gmra.mxu3 %v365_v7  ;;  %1260 = vmatpush.msra.mxu2 %v2102_v26  ;;  %v2780_v26 = vld [vmem:[#allocation24_spill] sm:$0xff] }
  0x95   : > { %586 = vmatmul.f32.gmra.mxu2 %v364_v53  ;;  %1101 = vmatpush.msra.mxu0 %v2777_v24 }
  0x96   : > { %1179 = vmatpush.msra.mxu1 %v2084_v21  ;;  %1035 = vmatpush.msrb.mxu3 %v2328_v43 }
  0x97   : > { %1104 = vmatpush.msra.mxu0 %v2778_v56  ;;  %1264 = vmatpush.msra.mxu2 %v2118_v33  ;;  %v2781_v33 = vld [vmem:[#allocation25_spill] sm:$0xff] }
  0x98   : > { %1181 = vmatpush.msra.mxu1 %v2104_v27  ;;  %1041 = vmatpush.msrb.mxu3 %v2337_v20 }
  0x99   : > { %1107 = vmatpush.msra.mxu0 %v2779_v25  ;;  %1268 = vmatpush.msra.mxu2 %v2122_v34 }
  0x9a   : > { %1343 = vmatpush.msra.mxu3 %v2053_v3  ;;  %736 = vmatmul.f32.vlgmr.msrb.gmra.mxu0 %v2204_v2  ;;  %v2782_v3 = vld [vmem:[#allocation27_spill] sm:$0xff] }
  0x9b   : > { %497 = vmatmul.f32.gmra.mxu1 %v2424_v59  ;;  %1110 = vmatpush.msra.mxu0 %v2780_v26 }
  0x9c   : > { %1183 = vmatpush.msra.mxu1 %v2135_v40  ;;  %1345 = vmatpush.msra.mxu3 %v2055_v4 }
  0x9d   : > { %1113 = vmatpush.msra.mxu0 %v2781_v33  ;;  %1272 = vmatpush.msra.mxu2 %v2139_v41 }
  0x9e   : > { %1185 = vmatpush.msra.mxu1 %v2150_v46  ;;  %1347 = vmatpush.msra.mxu3 %v2057_v5 }
  0x9f   : > { %1116 = vmatpush.msra.mxu0 %v2782_v3  ;;  %1276 = vmatpush.msra.mxu2 %v2157_v48 }
  0xa0   : > { %1187 = vmatpush.msra.mxu1 %v2163_v51  ;;  %1349 = vmatpush.msra.mxu3 %v2059_v9 }
  0xa1   : > { %1119 = vmatpush.msra.mxu0 %v2261_v61  ;;  %1280 = vmatpush.msra.mxu2 %v2173_v54 }
  0xa2   : > { %1189 = vmatpush.msra.mxu1 %v2182_v58  ;;  %740 = vmatmul.f32.gmra.mxu0 %v2249_v47 }
  0xa3   : > { %801 = vmatmul.f32.vlgmr.msrb.gmra.mxu1 %v2204_v2  ;;  %1122 = vmatpush.msra.mxu0 %v2275_v62 }
  0xa4   : > { %1191 = vmatpush.msra.mxu1 %v2195_v63  ;;  %1351 = vmatpush.msra.mxu3 %v2061_v10 }
  0xa5   : > { %1284 = vmatpush.msra.mxu2 %v2198_v0 }
  0xa6   : > { %1193 = vmatpush.msra.mxu1 %v2214_v12  ;;  %1353 = vmatpush.msra.mxu3 %v2063_v11 }
  0xa7   : > { %1288 = vmatpush.msra.mxu2 %v2217_v13 }
  0xa8   : > { %1195 = vmatpush.msra.mxu1 %v2237_v36  ;;  %1355 = vmatpush.msra.mxu3 %v2076_v17 }
  0xa9   : > { %1292 = vmatpush.msra.mxu2 %v2240_v39 }
  0xaa   : > { %744 = vmatmul.f32.gmra.mxu0 %v2308_v19  ;;  %1357 = vmatpush.msra.mxu3 %v2084_v21 }
  0xab   : > { %805 = vmatmul.f32.gmra.mxu1 %v2249_v47  ;;  %1296 = vmatpush.msra.mxu2 %v2258_v55 }
  0xac   : > { %1359 = vmatpush.msra.mxu3 %v2104_v27 }
  0xad   : > { %1300 = vmatpush.msra.mxu2 %v2272_v42 }
  0xae   : > { %1361 = vmatpush.msra.mxu3 %v2135_v40 }
  0xaf   : > { %1304 = vmatpush.msra.mxu2 %v2289_v8 }
  0xb0   : > { %1363 = vmatpush.msra.mxu3 %v2150_v46 }
  0xb1   : > { %1308 = vmatpush.msra.mxu2 %v2303_v22 }
  0xb2   : > { %748 = vmatmul.f32.gmra.mxu0 %v2341_v16  ;;  %1365 = vmatpush.msra.mxu3 %v2163_v51 }
  0xb3   : > { %809 = vmatmul.f32.gmra.mxu1 %v2308_v19 }
  0xb4   : > { %1367 = vmatpush.msra.mxu3 %v2182_v58 }
  0xb6   : > { %1369 = vmatpush.msra.mxu3 %v2195_v63 }
  0xb8   : > { %1371 = vmatpush.msra.mxu3 %v2214_v12 }
  0xba   : > { %752 = vmatmul.f32.gmra.mxu0 %v2362_v28  ;;  %1373 = vmatpush.msra.mxu3 %v2237_v36 }
  0xbb   : > { %813 = vmatmul.f32.gmra.mxu1 %v2341_v16 }
  0xc2   : > { %756 = vmatmul.f32.gmra.mxu0 %v2383_v18 }
  0xc3   : > { %817 = vmatmul.f32.gmra.mxu1 %v2362_v28 }
  0xca   : > { %760 = vmatmul.f32.gmra.mxu0 %v2404_v35 }
  0xcb   : > { %821 = vmatmul.f32.gmra.mxu1 %v2383_v18 }
  0xd2   : > { %764 = vmatmul.f32.gmra.mxu0 %v2424_v59 }
  0xd3   : > { %825 = vmatmul.f32.gmra.mxu1 %v2404_v35 }
  0xd7   : > { %v313_v4 = vpop.f32.mrf.mxu0 }
  0xdb   : > { %829 = vmatmul.f32.gmra.mxu1 %v2424_v59 }
  0xdf   : > { %v321_v5 = vpop.f32.mrf.mxu0  ;;  %v470_v9 = vpop.f32.mrf.mxu1 }
  0xe0   : > { %v552_v40 = vpop.f32.mrf.mxu2  ;;  %v626_v46 = vpop.f32.mrf.mxu3  ;;  %v471_v58 = vadd.f32 %v470_v9, %v313_v4 }
  0xe2   : > { %v553_v12 = vadd.f32 %v552_v40, %v471_v58 }
  0xe4   : > { %v627_v36 = vadd.f32 %v626_v46, %v553_v12 }
  0xe7   : > { %v329_v10 = vpop.f32.mrf.mxu0  ;;  %v474_v11 = vpop.f32.mrf.mxu1 }
  0xe8   : > { %v557_v54 = vpop.f32.mrf.mxu2  ;;  %v632_v63 = vpop.f32.mrf.mxu3  ;;  %v475_v39 = vadd.f32 %v474_v11, %v321_v5 }
  0xea   : > { %v558_v62 = vadd.f32 %v557_v54, %v475_v39 }
  0xec   : > { %v633_v16 = vadd.f32 %v632_v63, %v558_v62 }
  0xef   : > { %v337_v17 = vpop.f32.mrf.mxu0  ;;  %v478_v19 = vpop.f32.mrf.mxu1 }
  0xf0   : > { %v562_v13 = vpop.f32.mrf.mxu2  ;;  %v638_v43 = vpop.f32.mrf.mxu3  ;;  %v479_v28 = vadd.f32 %v478_v19, %v329_v10  ;;  %v2785_v10 = vld [vmem:[#allocation29_spill] sm:$0xff] }
  0xf2   : > { %v563_v7 = vadd.f32 %v562_v13, %v479_v28 }
  0xf4   : > { %v639_v1 = vadd.f32 %v638_v43, %v563_v7 }
  0xf7   : > { %v2530_v21 = vpop.f32.mrf.mxu0  ;;  %v482_v22 = vpop.f32.mrf.mxu1 }
  0xf8   : > { %v567_v18 = vpop.f32.mrf.mxu2  ;;  %v644_v31 = vpop.f32.mrf.mxu3  ;;  %v483_v30 = vadd.f32 %v482_v22, %v337_v17 }
  0xfa   : > { %v568_v4 = vadd.f32 %v567_v18, %v483_v30 }
  0xfc   : > { %v645_v22 = vadd.f32 %v644_v31, %v568_v4 }
  0xff   : > { %v2532_v27 = vpop.f32.mrf.mxu0  ;;  %v486_v34 = vpop.f32.mrf.mxu1 }
 0x100   : > { %v572_v24 = vpop.f32.mrf.mxu2  ;;  %v650_v19 = vpop.f32.mrf.mxu3  ;;  %v487_v40 = vadd.f32 %v486_v34, %v2530_v21 }
 0x107   : > { %v2534_v41 = vpop.f32.mrf.mxu0 }
 0x108   : > { %v2536_v42 = vpop.f32.mrf.mxu1 }
 0x10f   : > { %v2538_v48 = vpop.f32.mrf.mxu0 }
 0x110   : > { %v2540_v51 = vpop.f32.mrf.mxu1 }
 0x117   : > { %v737_v2 = vpop.f32.mrf.mxu0 }
 0x118   : > { %v2542_v0 = vpop.f32.mrf.mxu1  ;;  %v738_v47 = vadd.f32 %v737_v2, %v627_v36  ;;  %v573_v36 = vadd.f32 %v572_v24, %v487_v40 }
 0x11f   : > { %v741_v55 = vpop.f32.mrf.mxu0 }
 0x120   : > { %v802_v61 = vpop.f32.mrf.mxu1  ;;  %v742_v45 = vadd.f32 %v741_v55, %v633_v16  ;;  %v651_v55 = vadd.f32 %v650_v19, %v573_v36 }
 0x121   : > { %v803_v8 = vadd.f32 %v802_v61, %v738_v47  ;;  %v577_v47 = vpop.f32.mrf.mxu2  ;;  %v491_v61 = vadd.f32 %v2536_v42, %v2532_v27 }
 0x123   : > { %v2545_v20 = vsub.f32 %v2783_v52, %v803_v8  ;;  %v656_v52 = vpop.f32.mrf.mxu3 }
 0x125   : > { %v841_v35 = vmul.f32 %v2545_v20, %v2545_v20 }
 0x127   : > { %v2549_v50 = vand.u32 4294901760, %v841_v35  ;;  %v745_v59 = vpop.f32.mrf.mxu0 }
 0x128   : > { %v806_v53 = vpop.f32.mrf.mxu1  ;;  %v746_v56 = vadd.f32 %v745_v59, %v639_v1 }
 0x129   : > { %v882_v60 = vsub.f32 %v841_v35, %v2549_v50  ;;  %v807_v29 = vadd.f32 %v806_v53, %v742_v45  ;;  %1043 = vmatmul.f32.vlgmr.msrb.gmra.mxu3 %v2549_v50  ;;  %v582_v7 = vpop.f32.mrf.mxu2 }
 0x12b   : > { %v2554_v32 = vsub.f32 %v2784_v14, %v807_v29  ;;  %1125 = vmatmul.f32.vlgmr.msra.gmra.mxu0 %v882_v60  ;;  %v883_v38 = vand.u32 4294901760, %v882_v60  ;;  %v495_v29 = vadd.f32 %v2540_v51, %v2534_v41 }
 0x12d   : > { %v842_v49 = vmul.f32 %v2554_v32, %v2554_v32  ;;  %1199 = vmatmul.f32.vlgmr.msra.gmra.mxu1 %v883_v38  ;;  %v884_v23 = vsub.f32 %v882_v60, %v883_v38 }
 0x12f   : > { %v2558_v25 = vand.u32 4294901760, %v842_v49  ;;  %v885_v26 = vand.u32 4294901760, %v884_v23  ;;  %v749_v33 = vpop.f32.mrf.mxu0 }
 0x130   : > { %v810_v3 = vpop.f32.mrf.mxu1  ;;  %v750_v58 = vadd.f32 %v749_v33, %v645_v22 }
 0x131   : > { %v811_v5 = vadd.f32 %v810_v3, %v746_v56  ;;  %886 = vmatmul.f32.vlgmr.msrb.gmra.mxu2 %v885_v26  ;;  %1047 = vmatmul.f32.gmra.mxu3 %v2558_v25  ;;  %v890_v9 = vsub.f32 %v842_v49, %v2558_v25  ;;  %v662_v49 = vpop.f32.mrf.mxu3  ;;  %v499_v3 = vadd.f32 %v2542_v0, %v2538_v48 }
 0x133   : > { %v2563_v11 = vsub.f32 %v2785_v10, %v811_v5  ;;  %1130 = vmatmul.f32.gmra.mxu0 %v890_v9  ;;  %v891_v17 = vand.u32 4294901760, %v890_v9 }
 0x135   : > { %v843_v46 = vmul.f32 %v2563_v11, %v2563_v11  ;;  %1205 = vmatmul.f32.gmra.mxu1 %v891_v17  ;;  %v892_v54 = vsub.f32 %v890_v9, %v891_v17  ;;  %v587_v9 = vpop.f32.mrf.mxu2 }
 0x136   : > { %v588_v40 = vadd.f32 %v587_v9, %v499_v3 }
 0x137   : > { %v2568_v63 = vand.u32 4294901760, %v843_v46  ;;  %v893_v2 = vand.u32 4294901760, %v892_v54  ;;  %v753_v12 = vpop.f32.mrf.mxu0 }
 0x138   : > { %v814_v13 = vpop.f32.mrf.mxu1  ;;  %v754_v16 = vadd.f32 %v753_v12, %v651_v55 }
 0x139   : > { %v815_v39 = vadd.f32 %v814_v13, %v750_v58  ;;  %894 = vmatmul.f32.gmra.mxu2 %v893_v2  ;;  %1051 = vmatmul.f32.gmra.mxu3 %v2568_v63  ;;  %v898_v43 = vsub.f32 %v843_v46, %v2568_v63  ;;  %v668_v54 = vpop.f32.mrf.mxu3 }
 0x13a   : > { %v669_v2 = vadd.f32 %v668_v54, %v588_v40 }
 0x13b   : > { %v2573_v21 = vsub.f32 %v2332_v15, %v815_v39  ;;  %1135 = vmatmul.f32.gmra.mxu0 %v898_v43  ;;  %v899_v34 = vand.u32 4294901760, %v898_v43  ;;  %v578_v15 = vadd.f32 %v577_v47, %v491_v61 }
 0x13d   : > { %v844_v62 = vmul.f32 %v2573_v21, %v2573_v21  ;;  %1211 = vmatmul.f32.gmra.mxu1 %v899_v34  ;;  %v900_v8 = vsub.f32 %v898_v43, %v899_v34  ;;  %v657_v60 = vadd.f32 %v656_v52, %v578_v15 }
 0x13f   : > { %v2579_v28 = vand.u32 4294901760, %v844_v62  ;;  %v901_v18 = vand.u32 4294901760, %v900_v8  ;;  %v757_v35 = vpop.f32.mrf.mxu0 }
 0x140   : > { %v818_v45 = vpop.f32.mrf.mxu1  ;;  %v758_v38 = vadd.f32 %v757_v35, %v657_v60 }
 0x141   : > { %v819_v59 = vadd.f32 %v818_v45, %v754_v16  ;;  %902 = vmatmul.f32.gmra.mxu2 %v901_v18  ;;  %1055 = vmatmul.f32.gmra.mxu3 %v2579_v28  ;;  %v906_v53 = vsub.f32 %v844_v62, %v2579_v28 }
 0x143   : > { %v2584_v27 = vsub.f32 %v2356_v37, %v819_v59  ;;  %1140 = vmatmul.f32.gmra.mxu0 %v906_v53  ;;  %v907_v42 = vand.u32 4294901760, %v906_v53  ;;  %v583_v37 = vadd.f32 %v582_v7, %v495_v29 }
 0x145   : > { %v845_v31 = vmul.f32 %v2584_v27, %v2584_v27  ;;  %1217 = vmatmul.f32.gmra.mxu1 %v907_v42  ;;  %v908_v14 = vsub.f32 %v906_v53, %v907_v42  ;;  %v663_v33 = vadd.f32 %v662_v49, %v583_v37 }
 0x147   : > { %v2590_v1 = vand.u32 4294901760, %v845_v31  ;;  %v909_v30 = vand.u32 4294901760, %v908_v14  ;;  %v761_v26 = vpop.f32.mrf.mxu0 }
 0x148   : > { %v822_v23 = vpop.f32.mrf.mxu1  ;;  %v762_v10 = vadd.f32 %v761_v26, %v663_v33 }
 0x149   : > { %v823_v24 = vadd.f32 %v822_v23, %v758_v38  ;;  %910 = vmatmul.f32.gmra.mxu2 %v909_v30  ;;  %1059 = vmatmul.f32.gmra.mxu3 %v2590_v1  ;;  %v914_v56 = vsub.f32 %v845_v31, %v2590_v1 }
 0x14b   : > { %v2595_v41 = vsub.f32 %v2377_v44, %v823_v24  ;;  %1145 = vmatmul.f32.gmra.mxu0 %v914_v56  ;;  %v915_v51 = vand.u32 4294901760, %v914_v56 }
 0x14d   : > { %v846_v4 = vmul.f32 %v2595_v41, %v2595_v41  ;;  %1223 = vmatmul.f32.gmra.mxu1 %v915_v51  ;;  %v916_v5 = vsub.f32 %v914_v56, %v915_v51 }
 0x14f   : > { %v921_v17 = vand.u32 4294901760, %v846_v4  ;;  %v917_v19 = vand.u32 4294901760, %v916_v5  ;;  %v765_v0 = vpop.f32.mrf.mxu0 }
 0x150   : > { %v826_v22 = vpop.f32.mrf.mxu1  ;;  %v766_v36 = vadd.f32 %v765_v0, %v669_v2 }
 0x151   : > { %v827_v46 = vadd.f32 %v826_v22, %v762_v10  ;;  %918 = vmatmul.f32.gmra.mxu2 %v917_v19  ;;  %1063 = vmatmul.f32.gmra.mxu3 %v921_v17  ;;  %v922_v44 = vsub.f32 %v846_v4, %v921_v17 }
 0x153   : > { %v2602_v58 = vsub.f32 %v2398_v57, %v827_v46  ;;  %1150 = vmatmul.f32.gmra.mxu0 %v922_v44  ;;  %v923_v48 = vand.u32 4294901760, %v922_v44 }
 0x155   : > { %v847_v12 = vmul.f32 %v2602_v58, %v2602_v58  ;;  %1229 = vmatmul.f32.gmra.mxu1 %v923_v48  ;;  %v924_v13 = vsub.f32 %v922_v44, %v923_v48 }
 0x157   : > { %v929_v39 = vand.u32 4294901760, %v847_v12  ;;  %v925_v43 = vand.u32 4294901760, %v924_v13 }
 0x158   : > { %v830_v47 = vpop.f32.mrf.mxu1 }
 0x159   : > { %v831_v34 = vadd.f32 %v830_v47, %v766_v36  ;;  %926 = vmatmul.f32.gmra.mxu2 %v925_v43  ;;  %1067 = vmatmul.f32.gmra.mxu3 %v929_v39  ;;  %v930_v55 = vsub.f32 %v847_v12, %v929_v39 }
 0x15b   : > { %v2607_v57 = vsub.f32 %v2419_v6, %v831_v34  ;;  %1155 = vmatmul.f32.gmra.mxu0 %v930_v55  ;;  %v931_v61 = vand.u32 4294901760, %v930_v55 }
 0x15d   : > { %v848_v62 = vmul.f32 %v2607_v57, %v2607_v57  ;;  %1235 = vmatmul.f32.gmra.mxu1 %v931_v61  ;;  %v932_v8 = vsub.f32 %v930_v55, %v931_v61 }
 0x15f   : > { %v937_v52 = vand.u32 4294901760, %v848_v62  ;;  %v933_v16 = vand.u32 4294901760, %v932_v8 }
 0x161   : > { %934 = vmatmul.f32.gmra.mxu2 %v933_v16  ;;  %1071 = vmatmul.f32.gmra.mxu3 %v937_v52  ;;  %v938_v18 = vsub.f32 %v848_v62, %v937_v52 }
 0x163   : > { %1160 = vmatmul.f32.gmra.mxu0 %v938_v18  ;;  %v939_v35 = vand.u32 4294901760, %v938_v18 }
 0x165   : > { %1241 = vmatmul.f32.gmra.mxu1 %v939_v35  ;;  %v940_v45 = vsub.f32 %v938_v18, %v939_v35 }
 0x167   : > { %v941_v15 = vand.u32 4294901760, %v940_v45 }
 0x169   : > { %942 = vmatmul.f32.gmra.mxu2 %v941_v15  ;;  %1375 = vmatmul.f32.vlgmr.msra.gmra.mxu3 %v2549_v50 }
 0x171   : > { %1310 = vmatmul.f32.vlgmr.msra.gmra.mxu2 %v2549_v50  ;;  %1379 = vmatmul.f32.gmra.mxu3 %v2558_v25 }
 0x179   : > { %1314 = vmatmul.f32.gmra.mxu2 %v2558_v25  ;;  %1383 = vmatmul.f32.gmra.mxu3 %v2568_v63 }
 0x181   : > { %1318 = vmatmul.f32.gmra.mxu2 %v2568_v63  ;;  %1387 = vmatmul.f32.gmra.mxu3 %v2579_v28 }
 0x189   : > { %1322 = vmatmul.f32.gmra.mxu2 %v2579_v28  ;;  %1391 = vmatmul.f32.gmra.mxu3 %v2590_v1 }
 0x191   : > { %1326 = vmatmul.f32.gmra.mxu2 %v2590_v1  ;;  %1395 = vmatmul.f32.gmra.mxu3 %v921_v17 }
 0x199   : > { %1330 = vmatmul.f32.gmra.mxu2 %v921_v17  ;;  %1399 = vmatmul.f32.gmra.mxu3 %v929_v39 }
 0x1a1   : > { %1334 = vmatmul.f32.gmra.mxu2 %v929_v39  ;;  %1403 = vmatmul.f32.gmra.mxu3 %v937_v52 }
 0x1a8   : > { %v1126_v38 = vpop.f32.mrf.mxu0 }
 0x1a9   : > { %1338 = vmatmul.f32.gmra.mxu2 %v937_v52 }
 0x1aa   : > { %v1200_v1 = vpop.f32.mrf.mxu1 }
 0x1ac   : > { %v1044_v6 = vpop.f32.mrf.mxu3 }
 0x1b0   : > { %v1131_v37 = vpop.f32.mrf.mxu0 }
 0x1b2   : > { %v1206_v51 = vpop.f32.mrf.mxu1 }
 0x1b4   : > { %v887_v50 = vpop.f32.mrf.mxu2  ;;  %v1048_v25 = vpop.f32.mrf.mxu3 }
 0x1b5   : > { %v888_v23 = vadd.f32 1e-06, %v887_v50 }
 0x1b7   : > { %v1045_v24 = vadd.f32 %v1044_v6, %v888_v23 }
 0x1b8   : > { %v1136_v4 = vpop.f32.mrf.mxu0 }
 0x1b9   : > { %v1127_v3 = vadd.f32 %v1126_v38, %v1045_v24 }
 0x1ba   : > { %v1212_v44 = vpop.f32.mrf.mxu1 }
 0x1bb   : > { %v1201_v9 = vadd.f32 %v1200_v1, %v1127_v3 }
 0x1bc   : > { %v895_v59 = vpop.f32.mrf.mxu2  ;;  %v1052_v53 = vpop.f32.mrf.mxu3 }
 0x1bd   : > { %v896_v33 = vadd.f32 1e-06, %v895_v59 }
 0x1bf   : > { %v1049_v5 = vadd.f32 %v1048_v25, %v896_v33 }
 0x1c0   : > { %v1141_v13 = vpop.f32.mrf.mxu0 }
 0x1c1   : > { %v1132_v46 = vadd.f32 %v1131_v37, %v1049_v5 }
 0x1c2   : > { %v1218_v55 = vpop.f32.mrf.mxu1 }
 0x1c3   : > { %v1207_v48 = vadd.f32 %v1206_v51, %v1132_v46 }
 0x1c4   : > { %v903_v63 = vpop.f32.mrf.mxu2  ;;  %v1056_v42 = vpop.f32.mrf.mxu3 }
 0x1c5   : > { %v904_v22 = vadd.f32 1e-06, %v903_v63 }
 0x1c7   : > { %v1053_v54 = vadd.f32 %v1052_v53, %v904_v22 }
 0x1c8   : > { %v1146_v59 = vpop.f32.mrf.mxu0 }
 0x1c9   : > { %v1137_v47 = vadd.f32 %v1136_v4, %v1053_v54 }
 0x1ca   : > { %v1224_v24 = vpop.f32.mrf.mxu1 }
 0x1cb   : > { %v1213_v8 = vadd.f32 %v1212_v44, %v1137_v47 }
 0x1cc   : > { %v911_v7 = vpop.f32.mrf.mxu2  ;;  %v2621_v60 = vpop.f32.mrf.mxu3 }
 0x1cd   : > { %v912_v39 = vadd.f32 1e-06, %v911_v7  ;;  %v2635_v7 = vld [vmem:[#allocation5] ss:$0 sm:$0xff] }
 0x1cf   : > { %v1057_v62 = vadd.f32 %v1056_v42, %v912_v39 }
 0x1d1   : > { %v1142_v25 = vadd.f32 %v1141_v13, %v1057_v62 }
 0x1d3   : > { %v1219_v37 = vadd.f32 %v1218_v55, %v1142_v25 }
 0x1d4   : > { %v919_v28 = vpop.f32.mrf.mxu2  ;;  %v2623_v29 = vpop.f32.mrf.mxu3 }
 0x1d5   : > { %v920_v6 = vadd.f32 1e-06, %v919_v28  ;;  %v2642_v28 = vld [vmem:[%s2721_s2] ss:$0 sm:$0xff] }
 0x1d7   : > { %v1061_v1 = vadd.f32 %v2621_v60, %v920_v6 }
 0x1dc   : > { %v2625_v31 = vpop.f32.mrf.mxu2  ;;  %v2627_v14 = vpop.f32.mrf.mxu3 }
 0x1dd   : > { %v928_v60 = vadd.f32 1e-06, %v2625_v31 }
 0x1df   : > { %v1065_v31 = vadd.f32 %v2623_v29, %v928_v60 }
 0x1e4   : > { %v2629_v30 = vpop.f32.mrf.mxu2  ;;  %v2631_v49 = vpop.f32.mrf.mxu3 }
 0x1e5   : > { %v936_v47 = vadd.f32 1e-06, %v2629_v30 }
 0x1ec   : > { %v2633_v56 = vpop.f32.mrf.mxu2  ;;  %v1376_v26 = vpop.f32.mrf.mxu3 }
 0x1f4   : > { %v1311_v10 = vpop.f32.mrf.mxu2  ;;  %v1380_v17 = vpop.f32.mrf.mxu3 }
 0x1f5   : > { %v1312_v19 = vadd.f32 %v1311_v10, %v1201_v9  ;;  %v1147_v10 = vadd.f32 %v1146_v59, %v1061_v1 }
 0x1f7   : > { %v1377_v40 = vadd.f32 %v1376_v26, %v1312_v19 }
 0x1f9   : > { %1728 = vrsqrt.f32 %v1377_v40  ;;  %vm1413_vm1 = vweird.f32 %v1377_v40 }
 0x1fc   : > { %v1315_v0 = vpop.f32.mrf.mxu2  ;;  %v1384_v2 = vpop.f32.mrf.mxu3 }
 0x1fd   : > { %v1316_v12 = vadd.f32 %v1315_v0, %v1207_v48  ;;  %v1225_v48 = vadd.f32 %v1224_v24, %v1147_v10 }
 0x1ff   : > { %v1729_v36 = vpop.eup %1728  ;;  %v1381_v43 = vadd.f32 %v1380_v17, %v1316_v12 }
 0x200   : > { %v1408_v34 = vmul.f32 %v1729_v36, %v1377_v40  ;;  %vm1414_vm0 = vweird.f32 %v1729_v36  ;;  %v1151_v40 = vpop.f32.mrf.mxu0 }
 0x201   : > { %1730 = vrsqrt.f32 %v1381_v43  ;;  %vm1415_vm2 = vmor %vm1413_vm1, %vm1414_vm0  ;;  %vm1423_vm4 = vweird.f32 %v1381_v43 }
 0x202   : > { %v1409_v61 = vmul.f32 %v1729_v36, %v1408_v34 }
 0x204   : > { %v1410_v52 = vmul.f32 0.5, %v1409_v61  ;;  %v1319_v16 = vpop.f32.mrf.mxu2  ;;  %v1388_v45 = vpop.f32.mrf.mxu3  ;;  %v1152_v61 = vadd.f32 %v1151_v40, %v1065_v31 }
 0x205   : > { %v1320_v18 = vadd.f32 %v1319_v16, %v1213_v8  ;;  %v1069_v16 = vadd.f32 %v2627_v14, %v936_v47 }
 0x206   : > { %v1411_v35 = vsub.f32 1.5, %v1410_v52 }
 0x207   : > { %v1731_v15 = vpop.eup %1730  ;;  %v1385_v50 = vadd.f32 %v1384_v2, %v1320_v18 }
 0x208   : > { %v1412_v53 = vmul.f32 %v1729_v36, %v1411_v35  ;;  %v1418_v63 = vmul.f32 %v1731_v15, %v1381_v43  ;;  %vm1424_vm3 = vweird.f32 %v1731_v15 }
 0x209   : > { %1732 = vrsqrt.f32 %v1385_v50  ;;  %vm1425_vm5 = vmor %vm1423_vm4, %vm1424_vm3  ;;  %vm1433_vm7 = vweird.f32 %v1385_v50 }
 0x20a   : > { %v1416_v42 = vsel %vm1415_vm2, %v1729_v36, %v1412_v53  ;;  %v1419_v38 = vmul.f32 %v1731_v15, %v1418_v63  ;;  %v1230_v36 = vpop.f32.mrf.mxu1  ;;  %v944_v53 = vadd.f32 1e-06, %v2633_v56 }
 0x20b   : > { %v1487_v23 = vmul.f32 %v1416_v42, %v2545_v20  ;;  %v1231_v35 = vadd.f32 %v1230_v36, %v1152_v61 }
 0x20c   : > { %v1420_v26 = vmul.f32 0.5, %v1419_v38  ;;  %v1323_v51 = vpop.f32.mrf.mxu2  ;;  %v1392_v22 = vpop.f32.mrf.mxu3  ;;  %v1073_v24 = vadd.f32 %v2631_v49, %v944_v53 }
 0x20d   : > { %v1499_v33 = vmul.f32 %v2635_v7, %v1487_v23  ;;  %v1324_v3 = vadd.f32 %v1323_v51, %v1219_v37 }
 0x20e   : > { %v1421_v4 = vsub.f32 1.5, %v1420_v26 }
 0x20f   : > { %v1733_v5 = vpop.eup %1732  ;;  %v1511_v20 = vadd.f32 %v2642_v28, %v1499_v33  ;;  %v1389_v9 = vadd.f32 %v1388_v45, %v1324_v3  ;;  %v1156_v45 = vpop.f32.mrf.mxu0 }
 0x210   : > { %v1422_v17 = vmul.f32 %v1731_v15, %v1421_v4  ;;  %v1428_v19 = vmul.f32 %v1733_v5, %v1385_v50  ;;  %vm1434_vm6 = vweird.f32 %v1733_v5  ;;  %v1157_v38 = vadd.f32 %v1156_v45, %v1069_v16 }
 0x211   : > { %1519 = vst [vmem:[%s2649_s26] sm:$0xff] %v1511_v20  ;;  %1734 = vrsqrt.f32 %v1389_v9  ;;  %vm1435_vm8 = vmor %vm1433_vm7, %vm1434_vm6  ;;  %vm1443_vm10 = vweird.f32 %v1389_v9 }
 0x212   : > { %v1426_v46 = vsel %vm1425_vm5, %v1731_v15, %v1422_v17  ;;  %v1429_v44 = vmul.f32 %v1733_v5, %v1428_v19  ;;  %v1236_v14 = vpop.f32.mrf.mxu1 }
 0x213   : > { %v1488_v54 = vmul.f32 %v1426_v46, %v2554_v32  ;;  %v1237_v51 = vadd.f32 %v1236_v14, %v1157_v38 }
 0x214   : > { %v1430_v0 = vmul.f32 0.5, %v1429_v44  ;;  %v1327_v2 = vpop.f32.mrf.mxu2  ;;  %v1396_v52 = vpop.f32.mrf.mxu3 }
 0x215   : > { %v1500_v12 = vmul.f32 %v2635_v7, %v1488_v54  ;;  %v1328_v13 = vadd.f32 %v1327_v2, %v1225_v48 }
 0x216   : > { %v1431_v39 = vsub.f32 1.5, %v1430_v0 }
 0x217   : > { %v1735_v43 = vpop.eup %1734  ;;  %v1512_v34 = vadd.f32 %v2642_v28, %v1500_v12  ;;  %v1393_v55 = vadd.f32 %v1392_v22, %v1328_v13  ;;  %v1161_v60 = vpop.f32.mrf.mxu0 }
 0x218   : > { %v1432_v29 = vmul.f32 %v1733_v5, %v1431_v39  ;;  %v1438_v32 = vmul.f32 %v1735_v43, %v1389_v9  ;;  %vm1444_vm9 = vweird.f32 %v1735_v43  ;;  %v1162_v19 = vadd.f32 %v1161_v60, %v1073_v24 }
 0x219   : > { %1520 = vst [vmem:[%s2649_s26 + $0x8] sm:$0xff] %v1512_v34  ;;  %1736 = vrsqrt.f32 %v1393_v55  ;;  %vm1445_vm11 = vmor %vm1443_vm10, %vm1444_vm9  ;;  %vm1453_vm13 = vweird.f32 %v1393_v55 }
 0x21a   : > { %v1436_v62 = vsel %vm1435_vm8, %v1733_v5, %v1432_v29  ;;  %v1439_v8 = vmul.f32 %v1735_v43, %v1438_v32 }
 0x21b   : > { %v1489_v18 = vmul.f32 %v1436_v62, %v2563_v11 }
 0x21c   : > { %v1440_v30 = vmul.f32 0.5, %v1439_v8  ;;  %v1331_v15 = vpop.f32.mrf.mxu2  ;;  %v1400_v33 = vpop.f32.mrf.mxu3 }
 0x21d   : > { %v1501_v6 = vmul.f32 %v2635_v7, %v1489_v18  ;;  %v1332_v25 = vadd.f32 %v1331_v15, %v1231_v35 }
 0x21e   : > { %v1441_v50 = vsub.f32 1.5, %v1440_v30 }
 0x21f   : > { %v1737_v59 = vpop.eup %1736  ;;  %v1513_v63 = vadd.f32 %v2642_v28, %v1501_v6  ;;  %v1397_v42 = vadd.f32 %v1396_v52, %v1332_v25 }
 0x220   : > { %v1442_v1 = vmul.f32 %v1735_v43, %v1441_v50  ;;  %v1448_v11 = vmul.f32 %v1737_v59, %v1393_v55  ;;  %vm1454_vm12 = vweird.f32 %v1737_v59 }
 0x221   : > { %1521 = vst [vmem:[%s2649_s26 + $0x10] sm:$0xff] %v1513_v63  ;;  %1738 = vrsqrt.f32 %v1397_v42  ;;  %vm1455_vm14 = vmor %vm1453_vm13, %vm1454_vm12  ;;  %vm1463_vm0 = vweird.f32 %v1397_v42 }
 0x222   : > { %v1446_v23 = vsel %vm1445_vm11, %v1735_v43, %v1442_v1  ;;  %v1449_v37 = vmul.f32 %v1737_v59, %v1448_v11 }
 0x223   : > { %v1490_v26 = vmul.f32 %v1446_v23, %v2573_v21  ;;  %v1242_v21 = vpop.f32.mrf.mxu1 }
 0x224   : > { %v1450_v56 = vmul.f32 0.5, %v1449_v37  ;;  %v1335_v3 = vpop.f32.mrf.mxu2  ;;  %v1243_v31 = vadd.f32 %v1242_v21, %v1162_v19  ;;  %v1404_v13 = vpop.f32.mrf.mxu3 }
 0x225   : > { %v1502_v4 = vmul.f32 %v2635_v7, %v1490_v26  ;;  %v1336_v5 = vadd.f32 %v1335_v3, %v1237_v51 }
 0x226   : > { %v1451_v20 = vsub.f32 1.5, %v1450_v56 }
 0x227   : > { %v1739_v9 = vpop.eup %1738  ;;  %v1514_v10 = vadd.f32 %v2642_v28, %v1502_v4  ;;  %v1401_v17 = vadd.f32 %v1400_v33, %v1336_v5 }
 0x228   : > { %v1452_v22 = vmul.f32 %v1737_v59, %v1451_v20  ;;  %v1458_v49 = vmul.f32 %v1739_v9, %v1397_v42  ;;  %vm1464_vm15 = vweird.f32 %v1739_v9 }
 0x229   : > { %1522 = vst [vmem:[%s2649_s26 + $0x18] sm:$0xff] %v1514_v10  ;;  %1740 = vrsqrt.f32 %v1401_v17  ;;  %vm1465_vm1 = vmor %vm1463_vm0, %vm1464_vm15  ;;  %vm1473_vm3 = vweird.f32 %v1401_v17 }
 0x22a   : > { %v1456_v40 = vsel %vm1455_vm14, %v1737_v59, %v1452_v22  ;;  %v1459_v46 = vmul.f32 %v1739_v9, %v1458_v49 }
 0x22b   : > { %v1491_v44 = vmul.f32 %v1456_v40, %v2584_v27 }
 0x22c   : > { %v1460_v54 = vmul.f32 0.5, %v1459_v46  ;;  %v1339_v48 = vpop.f32.mrf.mxu2 }
 0x22d   : > { %v1503_v0 = vmul.f32 %v2635_v7, %v1491_v44  ;;  %v1340_v2 = vadd.f32 %v1339_v48, %v1243_v31 }
 0x22e   : > { %v1461_v12 = vsub.f32 1.5, %v1460_v54 }
 0x22f   : > { %v1741_v36 = vpop.eup %1740  ;;  %v1515_v39 = vadd.f32 %v2642_v28, %v1503_v0  ;;  %v1405_v43 = vadd.f32 %v1404_v13, %v1340_v2 }
 0x230   : > { %v1462_v47 = vmul.f32 %v1739_v9, %v1461_v12  ;;  %v1468_v34 = vmul.f32 %v1741_v36, %v1401_v17  ;;  %vm1474_vm2 = vweird.f32 %v1741_v36 }
 0x231   : > { %1523 = vst [vmem:[%s2649_s26 + $0x20] sm:$0xff] %v1515_v39  ;;  %1742 = vrsqrt.f32 %v1405_v43  ;;  %vm1475_vm4 = vmor %vm1473_vm3, %vm1474_vm2  ;;  %vm1483_vm6 = vweird.f32 %v1405_v43 }
 0x232   : > { %v1466_v27 = vsel %vm1465_vm1, %v1739_v9, %v1462_v47  ;;  %v1469_v55 = vmul.f32 %v1741_v36, %v1468_v34 }
 0x233   : > { %v1492_v61 = vmul.f32 %v1466_v27, %v2595_v41 }
 0x234   : > { %v1470_v29 = vmul.f32 0.5, %v1469_v55 }
 0x235   : > { %v1504_v32 = vmul.f32 %v2635_v7, %v1492_v61 }
 0x236   : > { %v1471_v62 = vsub.f32 1.5, %v1470_v29 }
 0x237   : > { %v1743_v8 = vpop.eup %1742  ;;  %v1516_v52 = vadd.f32 %v2642_v28, %v1504_v32 }
 0x238   : > { %v1472_v16 = vmul.f32 %v1741_v36, %v1471_v62  ;;  %v1478_v18 = vmul.f32 %v1743_v8, %v1405_v43  ;;  %vm1484_vm5 = vweird.f32 %v1743_v8 }
 0x239   : > { %1524 = vst [vmem:[%s2649_s26 + $0x28] sm:$0xff] %v1516_v52  ;;  %vm1485_vm7 = vmor %vm1483_vm6, %vm1484_vm5 }
 0x23a   : > { %v1476_v35 = vsel %vm1475_vm4, %v1741_v36, %v1472_v16  ;;  %v1479_v45 = vmul.f32 %v1743_v8, %v1478_v18 }
 0x23b   : > { %v1493_v41 = vmul.f32 %v1476_v35, %v2602_v58 }
 0x23c   : > { %v1480_v30 = vmul.f32 0.5, %v1479_v45 }
 0x23d   : > { %v1505_v15 = vmul.f32 %v2635_v7, %v1493_v41 }
 0x23e   : > { %v1481_v6 = vsub.f32 1.5, %v1480_v30 }
 0x23f   : > { %v1517_v25 = vadd.f32 %v2642_v28, %v1505_v15 }
 0x240   : > { %v1482_v50 = vmul.f32 %v1743_v8, %v1481_v6 }
 0x241   : > { %1525 = vst [vmem:[%s2649_s26 + $0x30] sm:$0xff] %v1517_v25 }
 0x242   : > { %v1486_v58 = vsel %vm1485_vm7, %v1743_v8, %v1482_v50 }
 0x243   : > { %v1494_v59 = vmul.f32 %v1486_v58, %v2607_v57 }
 0x245   : > { %v1506_v53 = vmul.f32 %v2635_v7, %v1494_v59 }
 0x247   : > { %v1518_v63 = vadd.f32 %v2642_v28, %v1506_v53 }
 0x249   : > { %1526 = vst [vmem:[%s2649_s26 + $0x38] sm:$0xff] %v1518_v63 }
 0x24a   : > { %1861 = shalt.err (!%p1858_p8)
}
 0x24b   : > { %s1910_s20 = smov 128   ;;  %s1911_s30 = smov 8  }
 0x24c   : > { %1665 = dma.vmem_to_hbm [thread:$0]  (%p1989_p11), %s1541_s10, 1024, %s1543_s19, %s1528_s6, %s1910_s20, %s1910_s20, %s1911_s30  }
 0x24d PF: > { %s1557_s9 = sand.u32 1, %s1892_s15   ;;  %p2786_p9 = scmp.ge.s32.totalorder %s1904_s18, 2 }
 0x24e   : > { %s1558_s3 = scalar_lea.sflag [#allocation4], %s1557_s9 }
 0x24f   : > { %p1679_p10 = pnand %p2786_p9, %p1993_p12 }
 0x251   : > { %p1680_p1 = pneg %p1679_p10 }
 0x253   : > { %1887 = dma.done.wait (%p1680_p1), %s1558_s3, 1024  }
 0x254   : > { %1889 = vsyncadd (%p1680_p1), %s1558_s3, 4294966272  ;;  %s2787_s1 = sld [smem:[#allocation12_spill]]  ;;  %p18_p2 = scmp.ge.s32.totalorder %s1962_s21, 4  }
 0x255   : > { %s2788_s15 = smov %s1896_s16  ;;  %s2789_s16 = smov %s1900_s17 }
 0x256   : > { %s2791_s18 = smov %s1962_s21  ;;  %20 = sbr.rel (!%p18_p2) target bundleno = 9 (0x9), region = 89 }
 0x25a   : > { %s2790_s17 = smov %s2787_s1 }
 0x25b   :  { %1564 = vsyncpa [#allocation3], 1 }
 0x25c   :  { %1566 = vsyncpa [#allocation3 + $0x1], 1 }
 0x25d   :  { %1567 = vsyncpa [#allocation6], 1 }
 0x25e   :  { %1568 = vsyncpa [#allocation4], 1 }
 0x25f   :  { %1570 = vsyncpa [#allocation4 + $0x1], 1 }

</bundles_post_ra>
